<compile_context>
chip_gen: v7x
topology: tpu7x:2x2x1
jax: 0.10.0
libtpu: 0.0.40
codegen_flags: <defaults>
</compile_context>

<pallas_src>
import functools

import jax
import jax.numpy as jnp
from jax.experimental import pallas as pl
from jax.experimental.pallas import tpu as pltpu


def _round_up(x, m):
    return ((x + m - 1) // m) * m


def _pick_tile_hw(hw, max_tile):
    """Largest spatial tile (multiple of 8, <= max_tile) that divides HW."""
    for cand in (1024, 512, 256, 128, 64, 32, 16, 8):
        if cand <= max_tile and hw % cand == 0:
            return cand
    return hw  # fall back to the full (untiled) spatial extent


def _custom_model_kernel(x_ref, w1_ref, b1_ref, w2_ref, b2_ref, out_ref,
                         acc_ref, *, inv_hw):
    # x_ref : (TB, THW, C) bf16   w1_ref: (C, Dp)  bf16
    # b1_ref: (1, Dp)      f32    w2_ref: (Dp, Kp) f32
    # b2_ref: (1, Kp)      f32    out_ref: (TB, Kp) f32
    # acc_ref: (TB, Dp)    f32 scratch (pooled-feature accumulator)
    s = pl.program_id(1)

    @pl.when(s == 0)
    def _():
        acc_ref[...] = jnp.zeros_like(acc_ref)

    tb, thw, c = x_ref.shape
    # Stand-in feature extractor: 1x1 conv == one tall 2-D matmul over channels.
    x2 = x_ref[...].reshape(tb * thw, c)                       # bf16
    h = jnp.dot(x2, w1_ref[...], preferred_element_type=jnp.float32)
    h = jnp.maximum(h + b1_ref[...], 0.0)                      # f32 elementwise
    # Partial global-average-pool: accumulate per-batch spatial sums.
    acc_ref[...] += h.reshape(tb, thw, -1).sum(axis=1)

    @pl.when(s == pl.num_programs(1) - 1)
    def _():
        feats = acc_ref[...] * inv_hw                          # (TB, Dp) f32
        logits = jnp.dot(feats, w2_ref[...],
                         preferred_element_type=jnp.float32) + b2_ref[...]
        out_ref[...] = logits.astype(out_ref.dtype)


def custom_model_forward(x_nchw, w1, b1, w2, b2, *, tile_hw=None):
    """x_nchw: (B, C, H, W) f32. Returns logits (B, num_classes) f32."""
    B, C, H, W = x_nchw.shape
    D = w1.shape[1]
    K = w2.shape[1]
    HW = H * W

    # Lane-dense padding of feature / class dims; sublane padding of batch.
    Dp = _round_up(max(D, 128), 128)
    Kp = _round_up(max(K, 128), 128)
    TB = 8
    Bp = _round_up(max(B, TB), TB)

    if tile_hw is None:
        # Keep the (TB*tile_hw, Dp) f32 intermediate around ~8 MiB so per-step
        # VMEM stays well under the 32 MiB scoped default (v5e/v6e/v7x safe).
        budget_rows = max(8, (8 * 1024 * 1024) // (Dp * 4 * TB))
        tile_hw = _pick_tile_hw(HW, min(512, budget_rows))
    assert HW % tile_hw == 0, (HW, tile_hw)

    # NCHW -> (B, HW, C) channels-last, in bf16 (halves HBM traffic for x).
    # TODO(synk): the transpose is still a separate XLA pass over x; folding it
    # into the kernel (reading NCHW blocks directly) would save one HBM trip.
    x = jnp.transpose(x_nchw.astype(jnp.bfloat16), (0, 2, 3, 1)).reshape(B, HW, C)
    x = jnp.pad(x, ((0, Bp - B), (0, 0), (0, 0)))

    w1p = jnp.pad(w1, ((0, 0), (0, Dp - D))).astype(jnp.bfloat16)            # (C, Dp)
    b1p = jnp.pad(b1.reshape(1, D), ((0, 0), (0, Dp - D))).astype(jnp.float32)
    w2p = jnp.pad(w2, ((0, Dp - D), (0, Kp - K))).astype(jnp.float32)        # (Dp, Kp)
    b2p = jnp.pad(b2.reshape(1, K), ((0, 0), (0, Kp - K))).astype(jnp.float32)

    grid = (Bp // TB, HW // tile_hw)
    kernel = functools.partial(_custom_model_kernel, inv_hw=1.0 / HW)

    out = pl.pallas_call(
        kernel,
        out_shape=jax.ShapeDtypeStruct((Bp, Kp), jnp.float32),
        grid_spec=pltpu.PrefetchScalarGridSpec(
            num_scalar_prefetch=0,
            grid=grid,
            in_specs=[
                pl.BlockSpec((TB, tile_hw, C), lambda b, s: (b, s, 0)),  # x
                pl.BlockSpec((C, Dp), lambda b, s: (0, 0)),              # w1
                pl.BlockSpec((1, Dp), lambda b, s: (0, 0)),              # b1
                pl.BlockSpec((Dp, Kp), lambda b, s: (0, 0)),             # w2
                pl.BlockSpec((1, Kp), lambda b, s: (0, 0)),              # b2
            ],
            out_specs=pl.BlockSpec((TB, Kp), lambda b, s: (b, 0)),
            scratch_shapes=[pltpu.VMEM((TB, Dp), jnp.float32)],
        ),
        compiler_params=pltpu.CompilerParams(
            dimension_semantics=("parallel", "arbitrary"),
        ),
    )(x, w1p, b1p, w2p, b2p)

    return out[:B, :K]


if __name__ == "__main__":
    # Small, module-consistent shapes.
    B, C, H, W = 2, 4, 16, 16
    image_feature_dim = 32
    num_classes = 10

    key = jax.random.PRNGKey(0)
    kx, kw1, kb1, kw2, kb2 = jax.random.split(key, 5)

    x = jax.random.normal(kx, (B, C, H, W), dtype=jnp.float32)

    # Deterministic parameter init (feature-extractor stand-in + classifier).
    w1 = jax.random.normal(kw1, (C, image_feature_dim), dtype=jnp.float32) * 0.1
    b1 = jax.random.normal(kb1, (image_feature_dim,), dtype=jnp.float32) * 0.01
    w2 = jax.random.normal(kw2, (image_feature_dim, num_classes),
                           dtype=jnp.float32) * 0.1
    b2 = jax.random.normal(kb2, (num_classes,), dtype=jnp.float32) * 0.01

    # tile_hw=128 so the toy shape exercises the multi-step spatial reduction
    # (grid = (1 batch tile, 2 spatial tiles)).
    logits = custom_model_forward(x, w1, b1, w2, b2, tile_hw=128)
    jax.block_until_ready(logits)
    assert logits.shape == (B, num_classes), logits.shape

    # Pure-JAX f32 reference of the stand-in forward pass.
    xr = jnp.transpose(x, (0, 2, 3, 1)).reshape(B, H * W, C)
    hr = jnp.maximum(jnp.einsum('bpc,cd->bpd', xr, w1) + b1, 0.0)
    ref = jnp.mean(hr, axis=1) @ w2 + b2
    assert jnp.allclose(logits, ref, rtol=2e-2, atol=2e-2), (
        float(jnp.max(jnp.abs(logits - ref))))

    print("KERNEL_OK")
</pallas_src>

<mosaic_0001>
module attributes {stable_mosaic.version = 11 : i64} {
  func.func @_custom_model_kernel(%arg0: i32, %arg1: i32, %arg2: memref<8x128x4xbf16, #tpu.memory_space<vmem>>, %arg3: memref<4x128xbf16, #tpu.memory_space<vmem>>, %arg4: memref<1x128xf32, #tpu.memory_space<vmem>>, %arg5: memref<128x128xf32, #tpu.memory_space<vmem>>, %arg6: memref<1x128xf32, #tpu.memory_space<vmem>>, %arg7: memref<8x128xf32, #tpu.memory_space<vmem>>, %arg8: memref<8x128xf32, #tpu.memory_space<vmem>>) attributes {dimension_semantics = [#tpu.dimension_semantics<parallel>, #tpu.dimension_semantics<arbitrary>], iteration_bounds = array<i64: 1, 2>, scalar_prefetch = 0 : i64, scratch_operands = 1 : i64, tpu.core_type = #tpu.core_type<tc>, window_params = [{transform_indices = @transform_0, window_bounds = array<i64: 8, 128, 4>}, {pipeline_mode = #tpu.pipeline_mode<synchronous>, transform_indices = @transform_1, window_bounds = array<i64: 4, 128>}, {pipeline_mode = #tpu.pipeline_mode<synchronous>, transform_indices = @transform_2, window_bounds = array<i64: 1, 128>}, {pipeline_mode = #tpu.pipeline_mode<synchronous>, transform_indices = @transform_3, window_bounds = array<i64: 128, 128>}, {pipeline_mode = #tpu.pipeline_mode<synchronous>, transform_indices = @transform_4, window_bounds = array<i64: 1, 128>}, {transform_indices = @transform_5, window_bounds = array<i64: 8, 128>}]} {
    %c0_i32 = arith.constant 0 : i32
    %0 = arith.cmpi eq, %arg1, %c0_i32 : i32
    %1 = arith.extui %0 : i1 to i32
    %c0_i32_0 = arith.constant 0 : i32
    %2 = arith.cmpi ne, %1, %c0_i32_0 : i32
    scf.if %2 {
      %cst_14 = arith.constant 0.000000e+00 : f32
      %20 = vector.broadcast %cst_14 : f32 to vector<8x128xf32>
      %c0_15 = arith.constant 0 : index
      %c0_16 = arith.constant 0 : index
      %21 = vector.load %arg8[%c0_15, %c0_16] : memref<8x128xf32, #tpu.memory_space<vmem>>, vector<8x128xf32>
      tpu.vector_store %arg8[%c0_15, %c0_16], %20 {strides = array<i32>} : memref<8x128xf32, #tpu.memory_space<vmem>>, vector<8x128xf32>,
    } else {
    }
    %c0 = arith.constant 0 : index
    %c0_1 = arith.constant 0 : index
    %c0_2 = arith.constant 0 : index
    %3 = vector.load %arg2[%c0, %c0_1, %c0_2] : memref<8x128x4xbf16, #tpu.memory_space<vmem>>, vector<8x128x4xbf16>
    %4 = vector.shape_cast %3 : vector<8x128x4xbf16> to vector<1024x4xbf16>
    %c0_3 = arith.constant 0 : index
    %c0_4 = arith.constant 0 : index
    %5 = vector.load %arg3[%c0_3, %c0_4] : memref<4x128xbf16, #tpu.memory_space<vmem>>, vector<4x128xbf16>
    %cst = arith.constant dense<0.000000e+00> : vector<1024x128xf32>
    %6 = tpu.matmul %4, %5, %cst {dimension_numbers = #tpu.dot_dimension_numbers<[1], [0], [0], [1], [0, 0, 1, 1], [], []>} : vector<1024x4xbf16>, vector<4x128xbf16>, vector<1024x128xf32> -> vector<1024x128xf32>
    %c0_5 = arith.constant 0 : index
    %c0_6 = arith.constant 0 : index
    %7 = vector.load %arg4[%c0_5, %c0_6] : memref<1x128xf32, #tpu.memory_space<vmem>>, vector<1x128xf32>
    %8 = vector.broadcast %7 : vector<1x128xf32> to vector<1024x128xf32>
    %9 = arith.addf %6, %8 : vector<1024x128xf32>
    %cst_7 = arith.constant 0.000000e+00 : f32
    %10 = vector.broadcast %cst_7 : f32 to vector<1024x128xf32>
    %11 = arith.maximumf %9, %10 : vector<1024x128xf32>
    %c0_8 = arith.constant 0 : index
    %c0_9 = arith.constant 0 : index
    %12 = vector.load %arg8[%c0_8, %c0_9] : memref<8x128xf32, #tpu.memory_space<vmem>>, vector<8x128xf32>
    %13 = vector.shape_cast %11 : vector<1024x128xf32> to vector<8x128x128xf32>
    %cst_10 = arith.constant dense<0.000000e+00> : vector<8x128xf32>
    %14 = vector.multi_reduction <add>, %13, %cst_10 [1] : vector<8x128x128xf32> to vector<8x128xf32>
    %15 = arith.addf %12, %14 : vector<8x128xf32>
    %c0_11 = arith.constant 0 : index
    %c0_12 = arith.constant 0 : index
    %16 = vector.load %arg8[%c0_11, %c0_12] : memref<8x128xf32, #tpu.memory_space<vmem>>, vector<8x128xf32>
    tpu.vector_store %arg8[%c0_11, %c0_12], %15 {strides = array<i32>} : memref<8x128xf32, #tpu.memory_space<vmem>>, vector<8x128xf32>,
    %c1_i32 = arith.constant 1 : i32
    %17 = arith.cmpi eq, %arg1, %c1_i32 : i32
    %18 = arith.extui %17 : i1 to i32
    %c0_i32_13 = arith.constant 0 : i32
    %19 = arith.cmpi ne, %18, %c0_i32_13 : i32
    scf.if %19 {
      %c0_14 = arith.constant 0 : index
      %c0_15 = arith.constant 0 : index
      %20 = vector.load %arg8[%c0_14, %c0_15] : memref<8x128xf32, #tpu.memory_space<vmem>>, vector<8x128xf32>
      %cst_16 = arith.constant 3.906250e-03 : f32
      %21 = vector.broadcast %cst_16 : f32 to vector<8x128xf32>
      %22 = arith.mulf %20, %21 : vector<8x128xf32>
      %c0_17 = arith.constant 0 : index
      %c0_18 = arith.constant 0 : index
      %23 = vector.load %arg5[%c0_17, %c0_18] : memref<128x128xf32, #tpu.memory_space<vmem>>, vector<128x128xf32>
      %cst_19 = arith.constant dense<0.000000e+00> : vector<8x128xf32>
      %24 = tpu.matmul %22, %23, %cst_19 {dimension_numbers = #tpu.dot_dimension_numbers<[1], [0], [0], [1], [0, 0, 1, 1], [], []>} : vector<8x128xf32>, vector<128x128xf32>, vector<8x128xf32> -> vector<8x128xf32>
      %c0_20 = arith.constant 0 : index
      %c0_21 = arith.constant 0 : index
      %25 = vector.load %arg6[%c0_20, %c0_21] : memref<1x128xf32, #tpu.memory_space<vmem>>, vector<1x128xf32>
      %26 = vector.broadcast %25 : vector<1x128xf32> to vector<8x128xf32>
      %27 = arith.addf %24, %26 : vector<8x128xf32>
      %c0_22 = arith.constant 0 : index
      %c0_23 = arith.constant 0 : index
      %28 = vector.load %arg7[%c0_22, %c0_23] : memref<8x128xf32, #tpu.memory_space<vmem>>, vector<8x128xf32>
      tpu.vector_store %arg7[%c0_22, %c0_23], %27 {strides = array<i32>} : memref<8x128xf32, #tpu.memory_space<vmem>>, vector<8x128xf32>,
    } else {
    }
    return
  }
  func.func @transform_0(%arg0: i32, %arg1: i32) -> (i32, i32, i32) {
    %c0_i32 = arith.constant 0 : i32
    %c0_i32_0 = arith.constant 0 : i32
    return %arg0, %arg1, %c0_i32 : i32, i32, i32
  }
  func.func @transform_1(%arg0: i32, %arg1: i32) -> (i32, i32) {
    %c0_i32 = arith.constant 0 : i32
    %c0_i32_0 = arith.constant 0 : i32
    %c0_i32_1 = arith.constant 0 : i32
    return %c0_i32, %c0_i32_0 : i32, i32
  }
  func.func @transform_2(%arg0: i32, %arg1: i32) -> (i32, i32) {
    %c0_i32 = arith.constant 0 : i32
    %c0_i32_0 = arith.constant 0 : i32
    %c0_i32_1 = arith.constant 0 : i32
    return %c0_i32, %c0_i32_0 : i32, i32
  }
  func.func @transform_3(%arg0: i32, %arg1: i32) -> (i32, i32) {
    %c0_i32 = arith.constant 0 : i32
    %c0_i32_0 = arith.constant 0 : i32
    %c0_i32_1 = arith.constant 0 : i32
    return %c0_i32, %c0_i32_0 : i32, i32
  }
  func.func @transform_4(%arg0: i32, %arg1: i32) -> (i32, i32) {
    %c0_i32 = arith.constant 0 : i32
    %c0_i32_0 = arith.constant 0 : i32
    %c0_i32_1 = arith.constant 0 : i32
    return %c0_i32, %c0_i32_0 : i32, i32
  }
  func.func @transform_5(%arg0: i32, %arg1: i32) -> (i32, i32) {
    %c0_i32 = arith.constant 0 : i32
    %c0_i32_0 = arith.constant 0 : i32
    return %arg0, %c0_i32 : i32, i32
  }
}

</mosaic_0001>

<bundles_post_ra>
// kernel: tpu_custom_call.1
= control target key start
LH: loop header
LB: loop body
LE: loop exit
PB: predicated region body
PF: predicated region fallthrough
CT: control target
= control target key end

     0   :  { %10 = vsyncpa [#allocation5], 0  ;;  %s3120_s18 = smov 0   ;;  %s3122_s19 = smov 0   ;;  %s3686_s0 = inlined_call_operand.vmem [shape: bf16[8,256,4], index: 0, kind: input, shape index: {}]   ;;  %s3687_s1 = inlined_call_operand.vmem [shape: bf16[4,128], index: 1, kind: input, shape index: {}]   ;;  %s3688_s2 = inlined_call_operand.vmem [shape: f32[1,128], index: 2, kind: input, shape index: {}]   ;;  %s3689_s3 = inlined_call_operand.vmem [shape: f32[128,128], index: 3, kind: input, shape index: {}]   ;;  %s3690_s4 = inlined_call_operand.vmem [shape: f32[1,128], index: 4, kind: input, shape index: {}]   ;;  %s3691_s5 = inlined_call_operand.hbm [shape: f32[8,128], index: 5, kind: output, shape index: {}]  }
   0x1   :  { %s3124_s20 = smov 0   ;;  %s3126_s21 = smov 0  }
   0x2   :  { %s3128_s22 = smov 0  }
   0x3 LB: > { %s2479_s23 = sadd.s32 4294967295, %s3083_s22   ;;  %s25_s24 = sadd.s32 1, %s3079_s21  ;;  %s3083_s22 = sphi %s3128_s22, %s16_s22   ;;  %s3079_s21 = sphi %s3126_s21, %s3696_s21   ;;  %s3075_s20 = sphi %s3124_s20, %s3695_s20   ;;  %s3071_s19 = sphi %s3122_s19, %s3694_s19   ;;  %s3067_s18 = sphi %s3120_s18, %s3693_s18  }
   0x4   : > { %p26_p0 = scmp.ge.s32.totalorder %s25_s24, 2  ;;  %p44_p1 = scmp.ne.s32.totalorder %s3071_s19, %s3067_s18 }
   0x5   : > { %p45_p2 = scmp.eq.s32.totalorder %s3083_s22, 0  ;;  %s37_s26 = sadd.s32 1, %s3071_s19 }
   0x6   : > { %s3698_s24 = smov (%p26_p0, %s25_s24), 0  ;;  %p2481_p5 = scmp.ge.s32.totalorder %s3083_s22, 2 }
   0x7   : > { %p46_p3 = por %p45_p2, %p44_p1  ;;  %s33_s25 = ssub.s32 %s3079_s21, %s3698_s24 }
   0x8   : > { %p35_p4 = scmp.eq.s32.totalorder %s33_s25, 0  ;;  %192 = sbr.rel (%p2481_p5) target bundleno = 51 (0x33), region = 32 }
   0xa   : > { %s3156_s27 = scalar_select %p35_p4, %s3071_s19, %s37_s26  }
   0xf   : > { %195 = sbr.rel (!%p46_p3) target bundleno = 51 (0x33), region = 36  ;;  %s197_s28 = sand.u32 (%p46_p3), 1, %s3071_s19  }
  0x10   : > { %s2623_s29 = sshll.u32 (%p46_p3), %s3079_s21, 6  ;;  %s2482_s30 = sshll.u32 (%p46_p3), %s197_s28, 9 }
  0x11   : > { %s3164_s8 = scalar_lea.vmem (%p46_p3), %s3686_s0, %s2623_s29  ;;  %s3169_s9 = scalar_lea.vmem (%p46_p3), [#allocation3], %s2482_s30 }
  0x12   : > { %v221_v0 = vld [vmem:[%s3164_s8] sm:$0xff] (%p46_p3)   ;;  %v225_v1 = vld [vmem:[%s3164_s8 + $0x8] sm:$0xff] (%p46_p3)   ;;  %v229_v2 = vld [vmem:[%s3164_s8 + $0x10] sm:$0xff] (%p46_p3)  }
  0x13   : > { %222 = vst [vmem:[%s3169_s9] sm:$0xff] (%p46_p3), %v221_v0   ;;  %226 = vst [vmem:[%s3169_s9 + $0x8] sm:$0xff] (%p46_p3), %v225_v1   ;;  %v233_v3 = vld [vmem:[%s3164_s8 + $0x18] sm:$0xff] (%p46_p3)   ;;  %v237_v4 = vld [vmem:[%s3164_s8 + $0x20] sm:$0xff] (%p46_p3)  }
  0x14   : > { %230 = vst [vmem:[%s3169_s9 + $0x10] sm:$0xff] (%p46_p3), %v229_v2   ;;  %v241_v5 = vld [vmem:[%s3164_s8 + $0x28] sm:$0xff] (%p46_p3)   ;;  %234 = vst [vmem:[%s3169_s9 + $0x18] sm:$0xff] (%p46_p3), %v233_v3   ;;  %v245_v6 = vld [vmem:[%s3164_s8 + $0x30] sm:$0xff] (%p46_p3)  }
  0x15   : > { %238 = vst [vmem:[%s3169_s9 + $0x20] sm:$0xff] (%p46_p3), %v237_v4   ;;  %242 = vst [vmem:[%s3169_s9 + $0x28] sm:$0xff] (%p46_p3), %v241_v5   ;;  %v249_v7 = vld [vmem:[%s3164_s8 + $0x38] sm:$0xff] (%p46_p3)   ;;  %v253_v8 = vld [vmem:[%s3164_s8 + $0x80] sm:$0xff] (%p46_p3)  }
  0x16   : > { %246 = vst [vmem:[%s3169_s9 + $0x30] sm:$0xff] %v245_v6   ;;  %250 = vst [vmem:[%s3169_s9 + $0x38] sm:$0xff] %v249_v7   ;;  %v257_v9 = vld [vmem:[%s3164_s8 + $0x88] sm:$0xff]   ;;  %v261_v10 = vld [vmem:[%s3164_s8 + $0x90] sm:$0xff]  }
  0x17   : > { %254 = vst [vmem:[%s3169_s9 + $0x40] sm:$0xff] %v253_v8   ;;  %v265_v11 = vld [vmem:[%s3164_s8 + $0x98] sm:$0xff]   ;;  %258 = vst [vmem:[%s3169_s9 + $0x48] sm:$0xff] %v257_v9   ;;  %v269_v12 = vld [vmem:[%s3164_s8 + $0xa0] sm:$0xff]  }
  0x18   : > { %262 = vst [vmem:[%s3169_s9 + $0x50] sm:$0xff] %v261_v10   ;;  %266 = vst [vmem:[%s3169_s9 + $0x58] sm:$0xff] %v265_v11   ;;  %v273_v13 = vld [vmem:[%s3164_s8 + $0xa8] sm:$0xff]   ;;  %v277_v14 = vld [vmem:[%s3164_s8 + $0xb0] sm:$0xff]  }
  0x19   : > { %270 = vst [vmem:[%s3169_s9 + $0x60] sm:$0xff] %v269_v12   ;;  %274 = vst [vmem:[%s3169_s9 + $0x68] sm:$0xff] %v273_v13   ;;  %v281_v15 = vld [vmem:[%s3164_s8 + $0xb8] sm:$0xff]   ;;  %v285_v16 = vld [vmem:[%s3164_s8 + $0x100] sm:$0xff]  }
  0x1a   : > { %278 = vst [vmem:[%s3169_s9 + $0x70] sm:$0xff] %v277_v14   ;;  %v289_v17 = vld [vmem:[%s3164_s8 + $0x108] sm:$0xff]   ;;  %282 = vst [vmem:[%s3169_s9 + $0x78] sm:$0xff] %v281_v15   ;;  %v293_v18 = vld [vmem:[%s3164_s8 + $0x110] sm:$0xff]  }
  0x1b   : > { %286 = vst [vmem:[%s3169_s9 + $0x80] sm:$0xff] %v285_v16   ;;  %290 = vst [vmem:[%s3169_s9 + $0x88] sm:$0xff] %v289_v17   ;;  %v297_v19 = vld [vmem:[%s3164_s8 + $0x118] sm:$0xff]   ;;  %v301_v20 = vld [vmem:[%s3164_s8 + $0x120] sm:$0xff]  }
  0x1c   : > { %294 = vst [vmem:[%s3169_s9 + $0x90] sm:$0xff] %v293_v18   ;;  %298 = vst [vmem:[%s3169_s9 + $0x98] sm:$0xff] %v297_v19   ;;  %v305_v21 = vld [vmem:[%s3164_s8 + $0x128] sm:$0xff]   ;;  %v309_v22 = vld [vmem:[%s3164_s8 + $0x130] sm:$0xff]  }
  0x1d   : > { %302 = vst [vmem:[%s3169_s9 + $0xa0] sm:$0xff] %v301_v20   ;;  %v313_v23 = vld [vmem:[%s3164_s8 + $0x138] sm:$0xff]   ;;  %306 = vst [vmem:[%s3169_s9 + $0xa8] sm:$0xff] %v305_v21   ;;  %v317_v24 = vld [vmem:[%s3164_s8 + $0x180] sm:$0xff]  }
  0x1e   : > { %310 = vst [vmem:[%s3169_s9 + $0xb0] sm:$0xff] %v309_v22   ;;  %314 = vst [vmem:[%s3169_s9 + $0xb8] sm:$0xff] %v313_v23   ;;  %v321_v25 = vld [vmem:[%s3164_s8 + $0x188] sm:$0xff]   ;;  %v325_v26 = vld [vmem:[%s3164_s8 + $0x190] sm:$0xff]  }
  0x1f   : > { %318 = vst [vmem:[%s3169_s9 + $0xc0] sm:$0xff] %v317_v24   ;;  %322 = vst [vmem:[%s3169_s9 + $0xc8] sm:$0xff] %v321_v25   ;;  %v329_v27 = vld [vmem:[%s3164_s8 + $0x198] sm:$0xff]   ;;  %v333_v28 = vld [vmem:[%s3164_s8 + $0x1a0] sm:$0xff]  }
  0x20   : > { %326 = vst [vmem:[%s3169_s9 + $0xd0] sm:$0xff] %v325_v26   ;;  %v337_v29 = vld [vmem:[%s3164_s8 + $0x1a8] sm:$0xff]   ;;  %330 = vst [vmem:[%s3169_s9 + $0xd8] sm:$0xff] %v329_v27   ;;  %v341_v30 = vld [vmem:[%s3164_s8 + $0x1b0] sm:$0xff]  }
  0x21   : > { %334 = vst [vmem:[%s3169_s9 + $0xe0] sm:$0xff] %v333_v28   ;;  %338 = vst [vmem:[%s3169_s9 + $0xe8] sm:$0xff] %v337_v29   ;;  %v345_v31 = vld [vmem:[%s3164_s8 + $0x1b8] sm:$0xff]   ;;  %v349_v32 = vld [vmem:[%s3164_s8 + $0x200] sm:$0xff]  }
  0x22   : > { %342 = vst [vmem:[%s3169_s9 + $0xf0] sm:$0xff] %v341_v30   ;;  %346 = vst [vmem:[%s3169_s9 + $0xf8] sm:$0xff] %v345_v31   ;;  %v353_v33 = vld [vmem:[%s3164_s8 + $0x208] sm:$0xff]   ;;  %v357_v34 = vld [vmem:[%s3164_s8 + $0x210] sm:$0xff]  }
  0x23   : > { %350 = vst [vmem:[%s3169_s9 + $0x100] sm:$0xff] %v349_v32   ;;  %v361_v35 = vld [vmem:[%s3164_s8 + $0x218] sm:$0xff]   ;;  %354 = vst [vmem:[%s3169_s9 + $0x108] sm:$0xff] %v353_v33   ;;  %v365_v36 = vld [vmem:[%s3164_s8 + $0x220] sm:$0xff]  }
  0x24   : > { %358 = vst [vmem:[%s3169_s9 + $0x110] sm:$0xff] %v357_v34   ;;  %362 = vst [vmem:[%s3169_s9 + $0x118] sm:$0xff] %v361_v35   ;;  %v369_v37 = vld [vmem:[%s3164_s8 + $0x228] sm:$0xff]   ;;  %v373_v38 = vld [vmem:[%s3164_s8 + $0x230] sm:$0xff]  }
  0x25   : > { %366 = vst [vmem:[%s3169_s9 + $0x120] sm:$0xff] %v365_v36   ;;  %370 = vst [vmem:[%s3169_s9 + $0x128] sm:$0xff] %v369_v37   ;;  %v377_v39 = vld [vmem:[%s3164_s8 + $0x238] sm:$0xff]   ;;  %v381_v40 = vld [vmem:[%s3164_s8 + $0x280] sm:$0xff]  }
  0x26   : > { %374 = vst [vmem:[%s3169_s9 + $0x130] sm:$0xff] %v373_v38   ;;  %v385_v41 = vld [vmem:[%s3164_s8 + $0x288] sm:$0xff]   ;;  %378 = vst [vmem:[%s3169_s9 + $0x138] sm:$0xff] %v377_v39   ;;  %v389_v42 = vld [vmem:[%s3164_s8 + $0x290] sm:$0xff]  }
  0x27   : > { %382 = vst [vmem:[%s3169_s9 + $0x140] sm:$0xff] %v381_v40   ;;  %386 = vst [vmem:[%s3169_s9 + $0x148] sm:$0xff] %v385_v41   ;;  %v393_v43 = vld [vmem:[%s3164_s8 + $0x298] sm:$0xff]   ;;  %v397_v44 = vld [vmem:[%s3164_s8 + $0x2a0] sm:$0xff]  }
  0x28   : > { %390 = vst [vmem:[%s3169_s9 + $0x150] sm:$0xff] %v389_v42   ;;  %394 = vst [vmem:[%s3169_s9 + $0x158] sm:$0xff] %v393_v43   ;;  %v401_v45 = vld [vmem:[%s3164_s8 + $0x2a8] sm:$0xff]   ;;  %v405_v46 = vld [vmem:[%s3164_s8 + $0x2b0] sm:$0xff]  }
  0x29   : > { %398 = vst [vmem:[%s3169_s9 + $0x160] sm:$0xff] %v397_v44   ;;  %v409_v47 = vld [vmem:[%s3164_s8 + $0x2b8] sm:$0xff]   ;;  %402 = vst [vmem:[%s3169_s9 + $0x168] sm:$0xff] %v401_v45   ;;  %v413_v48 = vld [vmem:[%s3164_s8 + $0x300] sm:$0xff]  }
  0x2a   : > { %406 = vst [vmem:[%s3169_s9 + $0x170] sm:$0xff] %v405_v46   ;;  %410 = vst [vmem:[%s3169_s9 + $0x178] sm:$0xff] %v409_v47   ;;  %v417_v49 = vld [vmem:[%s3164_s8 + $0x308] sm:$0xff]   ;;  %v421_v50 = vld [vmem:[%s3164_s8 + $0x310] sm:$0xff]  }
  0x2b   : > { %414 = vst [vmem:[%s3169_s9 + $0x180] sm:$0xff] %v413_v48   ;;  %418 = vst [vmem:[%s3169_s9 + $0x188] sm:$0xff] %v417_v49   ;;  %v425_v51 = vld [vmem:[%s3164_s8 + $0x318] sm:$0xff]   ;;  %v429_v52 = vld [vmem:[%s3164_s8 + $0x320] sm:$0xff]  }
  0x2c   : > { %422 = vst [vmem:[%s3169_s9 + $0x190] sm:$0xff] %v421_v50   ;;  %v433_v53 = vld [vmem:[%s3164_s8 + $0x328] sm:$0xff]   ;;  %426 = vst [vmem:[%s3169_s9 + $0x198] sm:$0xff] %v425_v51   ;;  %v437_v54 = vld [vmem:[%s3164_s8 + $0x330] sm:$0xff]  }
  0x2d   : > { %430 = vst [vmem:[%s3169_s9 + $0x1a0] sm:$0xff] %v429_v52   ;;  %434 = vst [vmem:[%s3169_s9 + $0x1a8] sm:$0xff] %v433_v53   ;;  %v441_v55 = vld [vmem:[%s3164_s8 + $0x338] sm:$0xff]   ;;  %v445_v56 = vld [vmem:[%s3164_s8 + $0x380] sm:$0xff]  }
  0x2e   : > { %438 = vst [vmem:[%s3169_s9 + $0x1b0] sm:$0xff] %v437_v54   ;;  %442 = vst [vmem:[%s3169_s9 + $0x1b8] sm:$0xff] %v441_v55   ;;  %v449_v57 = vld [vmem:[%s3164_s8 + $0x388] sm:$0xff]   ;;  %v453_v58 = vld [vmem:[%s3164_s8 + $0x390] sm:$0xff]  }
  0x2f   : > { %446 = vst [vmem:[%s3169_s9 + $0x1c0] sm:$0xff] %v445_v56   ;;  %v457_v59 = vld [vmem:[%s3164_s8 + $0x398] sm:$0xff]   ;;  %450 = vst [vmem:[%s3169_s9 + $0x1c8] sm:$0xff] %v449_v57   ;;  %v461_v60 = vld [vmem:[%s3164_s8 + $0x3a0] sm:$0xff]  }
  0x30   : > { %454 = vst [vmem:[%s3169_s9 + $0x1d0] sm:$0xff] %v453_v58   ;;  %458 = vst [vmem:[%s3169_s9 + $0x1d8] sm:$0xff] %v457_v59   ;;  %v465_v61 = vld [vmem:[%s3164_s8 + $0x3a8] sm:$0xff]   ;;  %v469_v62 = vld [vmem:[%s3164_s8 + $0x3b0] sm:$0xff]  }
  0x31   : > { %462 = vst [vmem:[%s3169_s9 + $0x1e0] sm:$0xff] %v461_v60   ;;  %466 = vst [vmem:[%s3169_s9 + $0x1e8] sm:$0xff] %v465_v61   ;;  %v473_v63 = vld [vmem:[%s3164_s8 + $0x3b8] sm:$0xff]  }
  0x32   : > { %470 = vst [vmem:[%s3169_s9 + $0x1f0] sm:$0xff] %v469_v62   ;;  %474 = vst [vmem:[%s3169_s9 + $0x1f8] sm:$0xff] %v473_v63  }
  0x33 PF: > { %p2485_p6 = scmp.ge.s32.totalorder %s3083_s22, 1  ;;  %p754_p7 = scmp.lt.s32.totalorder %s3083_s22, 3 }
  0x35   : > { %p755_p8 = pnand %p2485_p6, %p754_p7 }
  0x36   : > { %s761_s10 = sand.u32 (!%p755_p8), 1, %s3067_s18   ;;  %p2487_p9 = scmp.ne.s32.totalorder (!%p755_p8), %s3075_s20, 0 }
  0x37   : > { %758 = sbr.rel (%p755_p8) target bundleno = 706 (0x2c2), region = 77  ;;  %s2486_s11 = sshll.u32 (!%p755_p8), %s761_s10, 9 }
  0x38   : > { %s3299_s12 = scalar_lea.vmem (!%p755_p8), [#allocation3], %s2486_s11 }
  0x3e   : > { %789 = sbr.rel (%p2487_p9) target bundleno = 69 (0x45), region = 85  ;;  %v3085_v0 = vmov (!%p2487_p9), 0.0  }
  0x3f   : > { %790 = vst [vmem:[#allocation2] sm:$0xff] (!%p2487_p9), %v3085_v0 }
  0x45 PF: > { %v919_v1 = vld [vmem:[%s3687_s1] sm:$0x3]  ;;  %vm1440_vm0 = vcmask 1041408   ;;  %v2950_v2 = vld [vmem:[%s3299_s12] sm:$0xff]   ;;  %vm1247_vm1 = vcmask 31744   ;;  %v2952_v5 = vld [vmem:[%s3299_s12 + $0x8] sm:$0xff]  }
  0x46   : > { %2897 = vmatprep.subr.msk.bf16.mxu0 %vm1440_vm0, %v919_v1  ;;  %2898 = vmatprep.subr.msk.bf16.mxu1 %vm1440_vm0, %v919_v1  ;;  %v1442_v3 = vsel %vm1440_vm0, %v919_v1, 0  ;;  %v2951_v4 = vld [vmem:[%s3299_s12 + $0x100] sm:$0xff]   ;;  %v2953_v6 = vld [vmem:[%s3299_s12 + $0x108] sm:$0xff]   ;;  %v2954_v7 = vld [vmem:[%s3299_s12 + $0x10] sm:$0xff]   ;;  %vm2294_vm2 = vcmask 1041409   ;;  %vm2296_vm3 = vcmask 1042434  }
  0x47   : > { %2707 = vmatpush3.bf16.msra.mxu0 %v1442_v3  ;;  %2896 = vmatpush3.bf16.msra.mxu1 %v1442_v3  ;;  %v2955_v8 = vld [vmem:[%s3299_s12 + $0x110] sm:$0xff]   ;;  %v2956_v9 = vld [vmem:[%s3299_s12 + $0x18] sm:$0xff]   ;;  %v2958_v11 = vld [vmem:[%s3299_s12 + $0x20] sm:$0xff]   ;;  %vm2298_vm4 = vcmask 1043459   ;;  %vm2300_vm5 = vcmask 1044484   ;;  %vm2302_vm6 = vcmask 1045509  }
  0x48   : > { %2708 = vmatprep.mubr.msk.bf16.mxu0 %vm1247_vm1, %v2950_v2  ;;  %2772 = vmatprep.mubr.msk.bf16.mxu1 %vm1247_vm1, %v2951_v4  ;;  %v2957_v10 = vld [vmem:[%s3299_s12 + $0x118] sm:$0xff]   ;;  %v2959_v12 = vld [vmem:[%s3299_s12 + $0x120] sm:$0xff]   ;;  %v2960_v13 = vld [vmem:[%s3299_s12 + $0x28] sm:$0xff]   ;;  %vm2304_vm7 = vcmask 1046534   ;;  %vm2306_vm8 = vcmask 1047559   ;;  %p2617_p10 = scmp.ne.s32.totalorder %s3075_s20, 1 }
  0x49   : > { %v2961_v14 = vld [vmem:[%s3299_s12 + $0x128] sm:$0xff]   ;;  %v2962_v15 = vld [vmem:[%s3299_s12 + $0x30] sm:$0xff]   ;;  %v2964_v17 = vld [vmem:[%s3299_s12 + $0x38] sm:$0xff]   ;;  %vm3087_vm9 = vmmov (!%p2617_p10), 0  }
  0x4a   : > { %2709 = vmatmul.mubr.msk.bf16.vlgmr.msra.gmra.mrb[0].mxu0 %vm1247_vm1, %v2952_v5  ;;  %2773 = vmatmul.mubr.msk.bf16.vlgmr.msra.gmra.mrb[0].mxu1 %vm1247_vm1, %v2953_v6  ;;  %v2963_v16 = vld [vmem:[%s3299_s12 + $0x130] sm:$0xff]   ;;  %v2965_v18 = vld [vmem:[%s3299_s12 + $0x138] sm:$0xff]   ;;  %v2966_v19 = vld [vmem:[%s3299_s12 + $0x40] sm:$0xff]  }
  0x4b   : > { %2712 = vmatprep.mubr.msk.bf16.mxu0 %vm1247_vm1, %v2954_v7  ;;  %2776 = vmatprep.mubr.msk.bf16.mxu1 %vm1247_vm1, %v2955_v8  ;;  %v2967_v20 = vld [vmem:[%s3299_s12 + $0x140] sm:$0xff]   ;;  %v2968_v21 = vld [vmem:[%s3299_s12 + $0x48] sm:$0xff]   ;;  %v2970_v23 = vld [vmem:[%s3299_s12 + $0x50] sm:$0xff]  }
  0x4c   : > { %v2969_v22 = vld [vmem:[%s3299_s12 + $0x148] sm:$0xff]   ;;  %v2971_v24 = vld [vmem:[%s3299_s12 + $0x150] sm:$0xff]   ;;  %v2972_v25 = vld [vmem:[%s3299_s12 + $0x58] sm:$0xff]  }
  0x4d   : > { %v2973_v26 = vld [vmem:[%s3299_s12 + $0x158] sm:$0xff]   ;;  %v2974_v27 = vld [vmem:[%s3299_s12 + $0x60] sm:$0xff]   ;;  %v2976_v29 = vld [vmem:[%s3299_s12 + $0x68] sm:$0xff]  }
  0x4e   : > { %v2975_v28 = vld [vmem:[%s3299_s12 + $0x160] sm:$0xff]   ;;  %v2977_v30 = vld [vmem:[%s3299_s12 + $0x168] sm:$0xff]   ;;  %v2978_v31 = vld [vmem:[%s3299_s12 + $0x70] sm:$0xff]  }
  0x4f   : > { %v2979_v32 = vld [vmem:[%s3299_s12 + $0x170] sm:$0xff]   ;;  %v2980_v33 = vld [vmem:[%s3299_s12 + $0x78] sm:$0xff]   ;;  %v2982_v35 = vld [vmem:[%s3299_s12 + $0x80] sm:$0xff]  }
  0x50   : > { %v2981_v34 = vld [vmem:[%s3299_s12 + $0x178] sm:$0xff]   ;;  %v2983_v36 = vld [vmem:[%s3299_s12 + $0x180] sm:$0xff]   ;;  %v2984_v37 = vld [vmem:[%s3299_s12 + $0x88] sm:$0xff]  }
  0x51   : > { %v2985_v38 = vld [vmem:[%s3299_s12 + $0x188] sm:$0xff]   ;;  %v2986_v39 = vld [vmem:[%s3299_s12 + $0x90] sm:$0xff]   ;;  %v2988_v41 = vld [vmem:[%s3299_s12 + $0x98] sm:$0xff]  }
  0x52   : > { %2713 = vmatmul.mubr.msk.bf16.gmra.mrb[4].mxu0 %vm1247_vm1, %v2956_v9  ;;  %2777 = vmatmul.mubr.msk.bf16.gmra.mrb[4].mxu1 %vm1247_vm1, %v2957_v10  ;;  %v2987_v40 = vld [vmem:[%s3299_s12 + $0x190] sm:$0xff]   ;;  %v2989_v42 = vld [vmem:[%s3299_s12 + $0x198] sm:$0xff]   ;;  %v2990_v43 = vld [vmem:[%s3299_s12 + $0xa0] sm:$0xff]  }
  0x53   : > { %2716 = vmatprep.mubr.msk.bf16.mxu0 %vm1247_vm1, %v2958_v11  ;;  %2780 = vmatprep.mubr.msk.bf16.mxu1 %vm1247_vm1, %v2959_v12  ;;  %v2991_v44 = vld [vmem:[%s3299_s12 + $0x1a0] sm:$0xff]   ;;  %v2992_v45 = vld [vmem:[%s3299_s12 + $0xa8] sm:$0xff]   ;;  %v2994_v47 = vld [vmem:[%s3299_s12 + $0xb0] sm:$0xff]  }
  0x54   : > { %v2993_v46 = vld [vmem:[%s3299_s12 + $0x1a8] sm:$0xff]   ;;  %v2995_v48 = vld [vmem:[%s3299_s12 + $0x1b0] sm:$0xff]   ;;  %v2996_v49 = vld [vmem:[%s3299_s12 + $0xb8] sm:$0xff]  }
  0x55   : > { %v2997_v50 = vld [vmem:[%s3299_s12 + $0x1b8] sm:$0xff]   ;;  %v2998_v51 = vld [vmem:[%s3299_s12 + $0xc0] sm:$0xff]   ;;  %v3000_v53 = vld [vmem:[%s3299_s12 + $0xc8] sm:$0xff]  }
  0x56   : > { %v2999_v52 = vld [vmem:[%s3299_s12 + $0x1c0] sm:$0xff]   ;;  %v3001_v54 = vld [vmem:[%s3299_s12 + $0x1c8] sm:$0xff]   ;;  %v3002_v55 = vld [vmem:[%s3299_s12 + $0xd0] sm:$0xff]  }
  0x57   : > { %v3003_v56 = vld [vmem:[%s3299_s12 + $0x1d0] sm:$0xff]   ;;  %v3004_v57 = vld [vmem:[%s3299_s12 + $0xd8] sm:$0xff]   ;;  %v3006_v59 = vld [vmem:[%s3299_s12 + $0xe0] sm:$0xff]  }
  0x58   : > { %v3005_v58 = vld [vmem:[%s3299_s12 + $0x1d8] sm:$0xff]   ;;  %v3007_v60 = vld [vmem:[%s3299_s12 + $0x1e0] sm:$0xff]   ;;  %v3008_v61 = vld [vmem:[%s3299_s12 + $0xe8] sm:$0xff]  }
  0x59   : > { %v3009_v62 = vld [vmem:[%s3299_s12 + $0x1e8] sm:$0xff]   ;;  %v3010_v63 = vld [vmem:[%s3299_s12 + $0xf0] sm:$0xff]   ;;  %v3012_v1 = vld [vmem:[%s3299_s12 + $0xf8] sm:$0xff]  }
  0x5a   : > { %2717 = vmatmul.mubr.msk.bf16.gmra.mrb[8].mxu0 %vm1247_vm1, %v2960_v13  ;;  %2781 = vmatmul.mubr.msk.bf16.gmra.mrb[8].mxu1 %vm1247_vm1, %v2961_v14  ;;  %v3011_v0 = vld [vmem:[%s3299_s12 + $0x1f0] sm:$0xff]   ;;  %v3013_v2 = vld [vmem:[%s3299_s12 + $0x1f8] sm:$0xff]  }
  0x5b   : > { %2720 = vmatprep.mubr.msk.bf16.mxu0 %vm1247_vm1, %v2962_v15  ;;  %2784 = vmatprep.mubr.msk.bf16.mxu1 %vm1247_vm1, %v2963_v16  ;;  %v3436_v3 = vld [vmem:[%s3688_s2] ss:$0 sm:$0xff] }
  0x62   : > { %2721 = vmatmul.mubr.msk.bf16.gmra.mrb[12].mxu0 %vm1247_vm1, %v2964_v17  ;;  %2785 = vmatmul.mubr.msk.bf16.gmra.mrb[12].mxu1 %vm1247_vm1, %v2965_v18 }
  0x63   : > { %2724 = vmatprep.mubr.msk.bf16.mxu0 %vm1247_vm1, %v2966_v19  ;;  %2788 = vmatprep.mubr.msk.bf16.mxu1 %vm1247_vm1, %v2967_v20 }
  0x6a   : > { %2725 = vmatmul.mubr.msk.bf16.gmra.mrb[16].mxu0 %vm1247_vm1, %v2968_v21  ;;  %2789 = vmatmul.mubr.msk.bf16.gmra.mrb[16].mxu1 %vm1247_vm1, %v2969_v22 }
  0x6b   : > { %2728 = vmatprep.mubr.msk.bf16.mxu0 %vm1247_vm1, %v2970_v23  ;;  %2792 = vmatprep.mubr.msk.bf16.mxu1 %vm1247_vm1, %v2971_v24 }
  0x72   : > { %2729 = vmatmul.mubr.msk.bf16.gmra.mrb[20].mxu0 %vm1247_vm1, %v2972_v25  ;;  %2793 = vmatmul.mubr.msk.bf16.gmra.mrb[20].mxu1 %vm1247_vm1, %v2973_v26 }
  0x73   : > { %2732 = vmatprep.mubr.msk.bf16.mxu0 %vm1247_vm1, %v2974_v27  ;;  %2796 = vmatprep.mubr.msk.bf16.mxu1 %vm1247_vm1, %v2975_v28 }
  0x7a   : > { %2733 = vmatmul.mubr.msk.bf16.gmra.mrb[24].mxu0 %vm1247_vm1, %v2976_v29  ;;  %2797 = vmatmul.mubr.msk.bf16.gmra.mrb[24].mxu1 %vm1247_vm1, %v2977_v30 }
  0x7b   : > { %2736 = vmatprep.mubr.msk.bf16.mxu0 %vm1247_vm1, %v2978_v31  ;;  %2800 = vmatprep.mubr.msk.bf16.mxu1 %vm1247_vm1, %v2979_v32 }
  0x82   : > { %2737 = vmatmul.mubr.msk.bf16.gmra.mrb[28].mxu0 %vm1247_vm1, %v2980_v33  ;;  %2801 = vmatmul.mubr.msk.bf16.gmra.mrb[28].mxu1 %vm1247_vm1, %v2981_v34 }
  0x83   : > { %2740 = vmatprep.mubr.msk.bf16.mxu0 %vm1247_vm1, %v2982_v35  ;;  %2804 = vmatprep.mubr.msk.bf16.mxu1 %vm1247_vm1, %v2983_v36 }
  0x8a   : > { %2741 = vmatmul.mubr.msk.bf16.gmra.mrb[32].mxu0 %vm1247_vm1, %v2984_v37  ;;  %2805 = vmatmul.mubr.msk.bf16.gmra.mrb[32].mxu1 %vm1247_vm1, %v2985_v38 }
  0x8b   : > { %2744 = vmatprep.mubr.msk.bf16.mxu0 %vm1247_vm1, %v2986_v39  ;;  %2808 = vmatprep.mubr.msk.bf16.mxu1 %vm1247_vm1, %v2987_v40 }
  0x92   : > { %2745 = vmatmul.mubr.msk.bf16.gmra.mrb[36].mxu0 %vm1247_vm1, %v2988_v41  ;;  %2809 = vmatmul.mubr.msk.bf16.gmra.mrb[36].mxu1 %vm1247_vm1, %v2989_v42 }
  0x93   : > { %2748 = vmatprep.mubr.msk.bf16.mxu0 %vm1247_vm1, %v2990_v43  ;;  %2812 = vmatprep.mubr.msk.bf16.mxu1 %vm1247_vm1, %v2991_v44 }
  0x9a   : > { %2749 = vmatmul.mubr.msk.bf16.gmra.mrb[40].mxu0 %vm1247_vm1, %v2992_v45  ;;  %2813 = vmatmul.mubr.msk.bf16.gmra.mrb[40].mxu1 %vm1247_vm1, %v2993_v46 }
  0x9b   : > { %2752 = vmatprep.mubr.msk.bf16.mxu0 %vm1247_vm1, %v2994_v47  ;;  %2816 = vmatprep.mubr.msk.bf16.mxu1 %vm1247_vm1, %v2995_v48 }
  0xa2   : > { %2753 = vmatmul.mubr.msk.bf16.gmra.mrb[44].mxu0 %vm1247_vm1, %v2996_v49  ;;  %2817 = vmatmul.mubr.msk.bf16.gmra.mrb[44].mxu1 %vm1247_vm1, %v2997_v50 }
  0xa3   : > { %2756 = vmatprep.mubr.msk.bf16.mxu0 %vm1247_vm1, %v2998_v51  ;;  %2820 = vmatprep.mubr.msk.bf16.mxu1 %vm1247_vm1, %v2999_v52 }
  0xaa   : > { %2757 = vmatmul.mubr.msk.bf16.gmra.mrb[48].mxu0 %vm1247_vm1, %v3000_v53  ;;  %2821 = vmatmul.mubr.msk.bf16.gmra.mrb[48].mxu1 %vm1247_vm1, %v3001_v54 }
  0xab   : > { %2760 = vmatprep.mubr.msk.bf16.mxu0 %vm1247_vm1, %v3002_v55  ;;  %2824 = vmatprep.mubr.msk.bf16.mxu1 %vm1247_vm1, %v3003_v56 }
  0xb2   : > { %2761 = vmatmul.mubr.msk.bf16.gmra.mrb[52].mxu0 %vm1247_vm1, %v3004_v57  ;;  %2825 = vmatmul.mubr.msk.bf16.gmra.mrb[52].mxu1 %vm1247_vm1, %v3005_v58 }
  0xb3   : > { %2764 = vmatprep.mubr.msk.bf16.mxu0 %vm1247_vm1, %v3006_v59  ;;  %2828 = vmatprep.mubr.msk.bf16.mxu1 %vm1247_vm1, %v3007_v60 }
  0xba   : > { %2765 = vmatmul.mubr.msk.bf16.gmra.mrb[56].mxu0 %vm1247_vm1, %v3008_v61  ;;  %2829 = vmatmul.mubr.msk.bf16.gmra.mrb[56].mxu1 %vm1247_vm1, %v3009_v62 }
  0xbb   : > { %2768 = vmatprep.mubr.msk.bf16.mxu0 %vm1247_vm1, %v3010_v63  ;;  %2832 = vmatprep.mubr.msk.bf16.mxu1 %vm1247_vm1, %v3011_v0 }
  0xc2   : > { %2769 = vmatmul.mubr.msk.bf16.gmra.mrb[60].mxu0 %vm1247_vm1, %v3012_v1  ;;  %2833 = vmatmul.mubr.msk.bf16.gmra.mrb[60].mxu1 %vm1247_vm1, %v3013_v2 }
 0x11d   : > { %v2710_v4 = vpop.f32.mrb[0].mxu0  ;;  %v2774_v5 = vpop.f32.mrb[0].mxu1 }
 0x11e   : > { %v1478_v6 = vpop.f32.mrb[1].mxu0  ;;  %v1734_v8 = vpop.f32.mrb[1].mxu1  ;;  %v1743_v10 = vadd.f32 %v2774_v5, %v3436_v3  ;;  %v1487_v14 = vadd.f32 %v2710_v4, %v3436_v3 }
 0x11f   : > { %v1479_v7 = vadd.f32 %v3436_v3, %v1478_v6  ;;  %v2711_v9 = vpop.f32.mrb[2].mxu0  ;;  %v1735_v11 = vadd.f32 %v3436_v3, %v1734_v8  ;;  %v2775_v12 = vpop.f32.mrb[2].mxu1 }
 0x120   : > { %v1481_v13 = vpop.f32.mrb[3].mxu0  ;;  %v1737_v16 = vpop.f32.mrb[3].mxu1  ;;  %v1490_v20 = vadd.f32 %v2711_v9, %v3436_v3  ;;  %v2055_v22 = vmax.f32 %v1743_v10, 0.0  ;;  %v1746_v23 = vadd.f32 %v2775_v12, %v3436_v3  ;;  %v1991_v25 = vmax.f32 %v1487_v14, 0.0 }
 0x121   : > { %v1482_v15 = vadd.f32 %v3436_v3, %v1481_v13  ;;  %v2053_v17 = vmax.f32 %v1735_v11, 0.0  ;;  %v1738_v18 = vadd.f32 %v3436_v3, %v1737_v16  ;;  %v1989_v19 = vmax.f32 %v1479_v7, 0.0 }
 0x122   : > { %v1992_v31 = vmax.f32 %v1490_v20, 0.0  ;;  %v2056_v36 = vmax.f32 %v1746_v23, 0.0 }
 0x123   : > { %v1990_v21 = vmax.f32 %v1482_v15, 0.0  ;;  %v2054_v24 = vmax.f32 %v1738_v18, 0.0 }
 0x125   : > { %v2118_v26 = vadd.f32 %v1990_v21, %v1989_v19  ;;  %v2714_v27 = vpop.f32.mrb[4].mxu0  ;;  %v2202_v28 = vadd.f32 %v2054_v24, %v2053_v17  ;;  %v2778_v29 = vpop.f32.mrb[4].mxu1 }
 0x126   : > { %v1494_v30 = vpop.f32.mrb[5].mxu0  ;;  %v1750_v34 = vpop.f32.mrb[5].mxu1  ;;  %v1759_v41 = vadd.f32 %v2778_v29, %v3436_v3  ;;  %v1503_v45 = vadd.f32 %v2714_v27, %v3436_v3 }
 0x127   : > { %v2119_v32 = vadd.f32 %v2118_v26, %v1991_v25  ;;  %v1495_v33 = vadd.f32 %v3436_v3, %v1494_v30  ;;  %v2715_v35 = vpop.f32.mrb[6].mxu0  ;;  %v2203_v37 = vadd.f32 %v2202_v28, %v2055_v22  ;;  %v1751_v38 = vadd.f32 %v3436_v3, %v1750_v34  ;;  %v2779_v39 = vpop.f32.mrb[6].mxu1 }
 0x128   : > { %v1497_v40 = vpop.f32.mrb[7].mxu0  ;;  %v1753_v44 = vpop.f32.mrb[7].mxu1  ;;  %v1506_v52 = vadd.f32 %v2715_v35, %v3436_v3  ;;  %v2059_v54 = vmax.f32 %v1759_v41, 0.0  ;;  %v1762_v55 = vadd.f32 %v2779_v39, %v3436_v3  ;;  %v1995_v58 = vmax.f32 %v1503_v45, 0.0 }
 0x129   : > { %v1993_v42 = vmax.f32 %v1495_v33, 0.0  ;;  %v2120_v43 = vadd.f32 %v2119_v32, %v1992_v31  ;;  %v2057_v46 = vmax.f32 %v1751_v38, 0.0  ;;  %v2204_v47 = vadd.f32 %v2203_v37, %v2056_v36 }
 0x12a   : > { %v1498_v48 = vadd.f32 %v3436_v3, %v1497_v40  ;;  %v1754_v50 = vadd.f32 %v3436_v3, %v1753_v44  ;;  %v1996_v2 = vmax.f32 %v1506_v52, 0.0  ;;  %v2060_v8 = vmax.f32 %v1762_v55, 0.0 }
 0x12b   : > { %v2121_v49 = vadd.f32 %v2120_v43, %v1993_v42  ;;  %v2205_v51 = vadd.f32 %v2204_v47, %v2057_v46 }
 0x12c   : > { %v1994_v53 = vmax.f32 %v1498_v48, 0.0  ;;  %v2058_v56 = vmax.f32 %v1754_v50, 0.0 }
 0x12d   : > { %v2718_v57 = vpop.f32.mrb[8].mxu0  ;;  %v2782_v60 = vpop.f32.mrb[8].mxu1 }
 0x12e   : > { %v2122_v59 = vadd.f32 %v2121_v49, %v1994_v53  ;;  %v1510_v61 = vpop.f32.mrb[9].mxu0  ;;  %v2206_v62 = vadd.f32 %v2205_v51, %v2058_v56  ;;  %v1766_v0 = vpop.f32.mrb[9].mxu1  ;;  %v1775_v10 = vadd.f32 %v2782_v60, %v3436_v3  ;;  %v1519_v13 = vadd.f32 %v2718_v57, %v3436_v3 }
 0x12f   : > { %v1511_v63 = vadd.f32 %v3436_v3, %v1510_v61  ;;  %v2719_v1 = vpop.f32.mrb[10].mxu0  ;;  %v1767_v5 = vadd.f32 %v3436_v3, %v1766_v0  ;;  %v2783_v6 = vpop.f32.mrb[10].mxu1 }
 0x130   : > { %v2123_v4 = vadd.f32 %v2122_v59, %v1995_v58  ;;  %v1513_v7 = vpop.f32.mrb[11].mxu0  ;;  %v2207_v9 = vadd.f32 %v2206_v62, %v2059_v54  ;;  %v1769_v12 = vpop.f32.mrb[11].mxu1  ;;  %v1522_v20 = vadd.f32 %v2719_v1, %v3436_v3  ;;  %v2063_v22 = vmax.f32 %v1775_v10, 0.0 }
 0x131   : > { %v1997_v11 = vmax.f32 %v1511_v63, 0.0  ;;  %v2061_v15 = vmax.f32 %v1767_v5, 0.0  ;;  %v1514_v16 = vadd.f32 %v3436_v3, %v1513_v7  ;;  %v1770_v18 = vadd.f32 %v3436_v3, %v1769_v12 }
 0x132   : > { %v2124_v14 = vadd.f32 %v2123_v4, %v1996_v2  ;;  %v2208_v17 = vadd.f32 %v2207_v9, %v2060_v8  ;;  %v1778_v24 = vadd.f32 %v2783_v6, %v3436_v3  ;;  %v1999_v27 = vmax.f32 %v1519_v13, 0.0 }
 0x133   : > { %v1998_v21 = vmax.f32 %v1514_v16, 0.0  ;;  %v2062_v25 = vmax.f32 %v1770_v18, 0.0  ;;  %v2000_v35 = vmax.f32 %v1522_v20, 0.0 }
 0x134   : > { %v2125_v19 = vadd.f32 %v2124_v14, %v1997_v11  ;;  %v2209_v23 = vadd.f32 %v2208_v17, %v2061_v15  ;;  %v2064_v40 = vmax.f32 %v1778_v24, 0.0 }
 0x135   : > { %v2722_v26 = vpop.f32.mrb[12].mxu0  ;;  %v2786_v29 = vpop.f32.mrb[12].mxu1 }
 0x136   : > { %v2126_v28 = vadd.f32 %v2125_v19, %v1998_v21  ;;  %v1526_v30 = vpop.f32.mrb[13].mxu0  ;;  %v2210_v31 = vadd.f32 %v2209_v23, %v2062_v25  ;;  %v1782_v33 = vpop.f32.mrb[13].mxu1  ;;  %v1791_v42 = vadd.f32 %v2786_v29, %v3436_v3  ;;  %v1535_v45 = vadd.f32 %v2722_v26, %v3436_v3 }
 0x137   : > { %v1527_v32 = vadd.f32 %v3436_v3, %v1526_v30  ;;  %v2723_v34 = vpop.f32.mrb[14].mxu0  ;;  %v1783_v37 = vadd.f32 %v3436_v3, %v1782_v33  ;;  %v2787_v38 = vpop.f32.mrb[14].mxu1 }
 0x138   : > { %v2127_v36 = vadd.f32 %v2126_v28, %v1999_v27  ;;  %v1529_v39 = vpop.f32.mrb[15].mxu0  ;;  %v2211_v41 = vadd.f32 %v2210_v31, %v2063_v22  ;;  %v1785_v44 = vpop.f32.mrb[15].mxu1  ;;  %v1538_v52 = vadd.f32 %v2723_v34, %v3436_v3  ;;  %v2067_v54 = vmax.f32 %v1791_v42, 0.0 }
 0x139   : > { %v2001_v43 = vmax.f32 %v1527_v32, 0.0  ;;  %v2065_v47 = vmax.f32 %v1783_v37, 0.0  ;;  %v1530_v48 = vadd.f32 %v3436_v3, %v1529_v39  ;;  %v1786_v50 = vadd.f32 %v3436_v3, %v1785_v44 }
 0x13a   : > { %v2128_v46 = vadd.f32 %v2127_v36, %v2000_v35  ;;  %v2212_v49 = vadd.f32 %v2211_v41, %v2064_v40  ;;  %v1794_v56 = vadd.f32 %v2787_v38, %v3436_v3  ;;  %v2003_v59 = vmax.f32 %v1535_v45, 0.0 }
 0x13b   : > { %v2002_v53 = vmax.f32 %v1530_v48, 0.0  ;;  %v2066_v57 = vmax.f32 %v1786_v50, 0.0  ;;  %v2004_v2 = vmax.f32 %v1538_v52, 0.0 }
 0x13c   : > { %v2129_v51 = vadd.f32 %v2128_v46, %v2001_v43  ;;  %v2213_v55 = vadd.f32 %v2212_v49, %v2065_v47  ;;  %v2068_v9 = vmax.f32 %v1794_v56, 0.0 }
 0x13d   : > { %v2726_v58 = vpop.f32.mrb[16].mxu0  ;;  %v2790_v61 = vpop.f32.mrb[16].mxu1 }
 0x13e   : > { %v2130_v60 = vadd.f32 %v2129_v51, %v2002_v53  ;;  %v1542_v62 = vpop.f32.mrb[17].mxu0  ;;  %v2214_v63 = vadd.f32 %v2213_v55, %v2066_v57  ;;  %v1798_v0 = vpop.f32.mrb[17].mxu1  ;;  %v1807_v11 = vadd.f32 %v2790_v61, %v3436_v3  ;;  %v1551_v14 = vadd.f32 %v2726_v58, %v3436_v3 }
 0x13f   : > { %v2727_v1 = vpop.f32.mrb[18].mxu0  ;;  %v1543_v5 = vadd.f32 %v3436_v3, %v1542_v62  ;;  %v1799_v6 = vadd.f32 %v3436_v3, %v1798_v0  ;;  %v2791_v7 = vpop.f32.mrb[18].mxu1 }
 0x140   : > { %v2131_v4 = vadd.f32 %v2130_v60, %v2003_v59  ;;  %v1545_v8 = vpop.f32.mrb[19].mxu0  ;;  %v2215_v10 = vadd.f32 %v2214_v63, %v2067_v54  ;;  %v1801_v12 = vpop.f32.mrb[19].mxu1  ;;  %v1554_v20 = vadd.f32 %v2727_v1, %v3436_v3  ;;  %v2071_v22 = vmax.f32 %v1807_v11, 0.0 }
 0x141   : > { %v1546_v15 = vadd.f32 %v3436_v3, %v1545_v8  ;;  %v2069_v17 = vmax.f32 %v1799_v6, 0.0  ;;  %v1802_v18 = vadd.f32 %v3436_v3, %v1801_v12  ;;  %v2005_v19 = vmax.f32 %v1543_v5, 0.0 }
 0x142   : > { %v3473_v13 = vadd.f32 %v2131_v4, %v2004_v2  ;;  %v3477_v16 = vadd.f32 %v2215_v10, %v2068_v9  ;;  %v1810_v23 = vadd.f32 %v2791_v7, %v3436_v3  ;;  %v2007_v26 = vmax.f32 %v1551_v14, 0.0 }
 0x143   : > { %v2006_v21 = vmax.f32 %v1546_v15, 0.0  ;;  %v2070_v24 = vmax.f32 %v1802_v18, 0.0  ;;  %v2008_v34 = vmax.f32 %v1554_v20, 0.0 }
 0x144   : > { %v2072_v39 = vmax.f32 %v1810_v23, 0.0 }
 0x145   : > { %v2730_v25 = vpop.f32.mrb[20].mxu0  ;;  %v2139_v27 = vadd.f32 %v2006_v21, %v2005_v19  ;;  %v2794_v28 = vpop.f32.mrb[20].mxu1  ;;  %v2223_v30 = vadd.f32 %v2070_v24, %v2069_v17 }
 0x146   : > { %v1558_v29 = vpop.f32.mrb[21].mxu0  ;;  %v1814_v32 = vpop.f32.mrb[21].mxu1  ;;  %v1823_v43 = vadd.f32 %v2794_v28, %v3436_v3  ;;  %v1567_v46 = vadd.f32 %v2730_v25, %v3436_v3 }
 0x147   : > { %v1559_v31 = vadd.f32 %v3436_v3, %v1558_v29  ;;  %v2731_v33 = vpop.f32.mrb[22].mxu0  ;;  %v2140_v35 = vadd.f32 %v2139_v27, %v2007_v26  ;;  %v1815_v36 = vadd.f32 %v3436_v3, %v1814_v32  ;;  %v2795_v37 = vpop.f32.mrb[22].mxu1  ;;  %v2224_v40 = vadd.f32 %v2223_v30, %v2071_v22 }
 0x148   : > { %v1561_v38 = vpop.f32.mrb[23].mxu0  ;;  %v1817_v42 = vpop.f32.mrb[23].mxu1  ;;  %v1570_v52 = vadd.f32 %v2731_v33, %v3436_v3  ;;  %v1826_v53 = vadd.f32 %v2795_v37, %v3436_v3  ;;  %v2075_v56 = vmax.f32 %v1823_v43, 0.0  ;;  %v2011_v60 = vmax.f32 %v1567_v46, 0.0 }
 0x149   : > { %v2009_v41 = vmax.f32 %v1559_v31, 0.0  ;;  %v2141_v44 = vadd.f32 %v2140_v35, %v2008_v34  ;;  %v2073_v45 = vmax.f32 %v1815_v36, 0.0  ;;  %v2225_v47 = vadd.f32 %v2224_v40, %v2072_v39 }
 0x14a   : > { %v1562_v48 = vadd.f32 %v3436_v3, %v1561_v38  ;;  %v1818_v50 = vadd.f32 %v3436_v3, %v1817_v42  ;;  %v2012_v6 = vmax.f32 %v1570_v52, 0.0  ;;  %v2076_v7 = vmax.f32 %v1826_v53, 0.0 }
 0x14b   : > { %v2142_v49 = vadd.f32 %v2141_v44, %v2009_v41  ;;  %v2226_v51 = vadd.f32 %v2225_v47, %v2073_v45  ;;  %v2133_v36 = vrot.slane %v3473_v13, 4 }
 0x14c   : > { %v2010_v54 = vmax.f32 %v1562_v48, 0.0  ;;  %v2074_v57 = vmax.f32 %v1818_v50, 0.0 }
 0x14d   : > { %v2734_v55 = vpop.f32.mrb[24].mxu0  ;;  %v2798_v58 = vpop.f32.mrb[24].mxu1 }
 0x14e   : > { %v1574_v59 = vpop.f32.mrb[25].mxu0  ;;  %v2143_v61 = vadd.f32 %v2142_v49, %v2010_v54  ;;  %v1830_v63 = vpop.f32.mrb[25].mxu1  ;;  %v2227_v1 = vadd.f32 %v2226_v51, %v2074_v57  ;;  %v1839_v12 = vadd.f32 %v2798_v58, %v3436_v3  ;;  %v1583_v17 = vadd.f32 %v2734_v55, %v3436_v3 }
 0x14f   : > { %v1575_v62 = vadd.f32 %v3436_v3, %v1574_v59  ;;  %v2735_v0 = vpop.f32.mrb[26].mxu0  ;;  %v1831_v2 = vadd.f32 %v3436_v3, %v1830_v63  ;;  %v2799_v4 = vpop.f32.mrb[26].mxu1  ;;  %v2134_v55 = vadd.f32 %v2133_v36, %v3473_v13 }
 0x150   : > { %v1577_v5 = vpop.f32.mrb[27].mxu0  ;;  %v2144_v8 = vadd.f32 %v2143_v61, %v2011_v60  ;;  %v1833_v10 = vpop.f32.mrb[27].mxu1  ;;  %v2228_v11 = vadd.f32 %v2227_v1, %v2075_v56  ;;  %v1586_v23 = vadd.f32 %v2735_v0, %v3436_v3  ;;  %v1842_v24 = vadd.f32 %v2799_v4, %v3436_v3 }
 0x151   : > { %v2013_v9 = vmax.f32 %v1575_v62, 0.0  ;;  %v2077_v14 = vmax.f32 %v1831_v2, 0.0  ;;  %v1578_v15 = vadd.f32 %v3436_v3, %v1577_v5  ;;  %v1834_v19 = vadd.f32 %v3436_v3, %v1833_v10 }
 0x152   : > { %v2145_v18 = vadd.f32 %v2144_v8, %v2012_v6  ;;  %v2229_v20 = vadd.f32 %v2228_v11, %v2076_v7  ;;  %v2079_v27 = vmax.f32 %v1839_v12, 0.0  ;;  %v2015_v31 = vmax.f32 %v1583_v17, 0.0 }
 0x153   : > { %v2014_v21 = vmax.f32 %v1578_v15, 0.0  ;;  %v2078_v25 = vmax.f32 %v1834_v19, 0.0  ;;  %v2016_v41 = vmax.f32 %v1586_v23, 0.0  ;;  %v2080_v42 = vmax.f32 %v1842_v24, 0.0 }
 0x154   : > { %v2146_v22 = vadd.f32 %v2145_v18, %v2013_v9  ;;  %v2230_v28 = vadd.f32 %v2229_v20, %v2077_v14  ;;  %v2135_v10 = vrot.slane %v2134_v55, 2 }
 0x155   : > { %v2738_v26 = vpop.f32.mrb[28].mxu0  ;;  %v2802_v29 = vpop.f32.mrb[28].mxu1 }
 0x156   : > { %v1590_v30 = vpop.f32.mrb[29].mxu0  ;;  %v2147_v32 = vadd.f32 %v2146_v22, %v2014_v21  ;;  %v1846_v34 = vpop.f32.mrb[29].mxu1  ;;  %v2231_v37 = vadd.f32 %v2230_v28, %v2078_v25  ;;  %v1855_v47 = vadd.f32 %v2802_v29, %v3436_v3  ;;  %v1599_v50 = vadd.f32 %v2738_v26, %v3436_v3 }
 0x157   : > { %v1591_v33 = vadd.f32 %v3436_v3, %v1590_v30  ;;  %v2739_v35 = vpop.f32.mrb[30].mxu0  ;;  %v1847_v38 = vadd.f32 %v3436_v3, %v1846_v34  ;;  %v2803_v39 = vpop.f32.mrb[30].mxu1 }
 0x158   : > { %v1593_v40 = vpop.f32.mrb[31].mxu0  ;;  %v2148_v43 = vadd.f32 %v2147_v32, %v2015_v31  ;;  %v1849_v45 = vpop.f32.mrb[31].mxu1  ;;  %v2232_v46 = vadd.f32 %v2231_v37, %v2079_v27  ;;  %v1602_v57 = vadd.f32 %v2739_v35, %v3436_v3  ;;  %v2083_v60 = vmax.f32 %v1855_v47, 0.0 }
 0x159   : > { %v2017_v44 = vmax.f32 %v1591_v33, 0.0  ;;  %v2081_v48 = vmax.f32 %v1847_v38, 0.0  ;;  %v1594_v49 = vadd.f32 %v3436_v3, %v1593_v40  ;;  %v1850_v52 = vadd.f32 %v3436_v3, %v1849_v45 }
 0x15a   : > { %v2149_v51 = vadd.f32 %v2148_v43, %v2016_v41  ;;  %v2233_v53 = vadd.f32 %v2232_v46, %v2080_v42  ;;  %v1858_v62 = vadd.f32 %v2803_v39, %v3436_v3  ;;  %v2019_v1 = vmax.f32 %v1599_v50, 0.0 }
 0x15b   : > { %v2018_v54 = vmax.f32 %v1594_v49, 0.0  ;;  %v2082_v58 = vmax.f32 %v1850_v52, 0.0  ;;  %v2020_v11 = vmax.f32 %v1602_v57, 0.0  ;;  %v2136_v33 = vadd.f32 %v2135_v10, %v2134_v55 }
 0x15c   : > { %v2150_v56 = vadd.f32 %v2149_v51, %v2017_v44  ;;  %v2234_v61 = vadd.f32 %v2233_v53, %v2081_v48  ;;  %v2084_v17 = vmax.f32 %v1858_v62, 0.0 }
 0x15d   : > { %v2742_v59 = vpop.f32.mrb[32].mxu0  ;;  %v2806_v63 = vpop.f32.mrb[32].mxu1  ;;  %v2137_v53 = vrot.slane %v2136_v33, 1 }
 0x15e   : > { %v1606_v0 = vpop.f32.mrb[33].mxu0  ;;  %v2151_v2 = vadd.f32 %v2150_v56, %v2018_v54  ;;  %v1862_v4 = vpop.f32.mrb[33].mxu1  ;;  %v2235_v6 = vadd.f32 %v2234_v61, %v2082_v58  ;;  %v1871_v14 = vadd.f32 %v2806_v63, %v3436_v3  ;;  %v1615_v19 = vadd.f32 %v2742_v59, %v3436_v3 }
 0x15f   : > { %v2743_v5 = vpop.f32.mrb[34].mxu0  ;;  %v1607_v7 = vadd.f32 %v3436_v3, %v1606_v0  ;;  %v1863_v13 = vadd.f32 %v3436_v3, %v1862_v4  ;;  %v2807_v8 = vpop.f32.mrb[34].mxu1 }
 0x160   : > { %v1609_v9 = vpop.f32.mrb[35].mxu0  ;;  %v2152_v12 = vadd.f32 %v2151_v2, %v2019_v1  ;;  %v1865_v15 = vpop.f32.mrb[35].mxu1  ;;  %v2236_v18 = vadd.f32 %v2235_v6, %v2083_v60  ;;  %v1618_v26 = vadd.f32 %v2743_v5, %v3436_v3  ;;  %v2087_v29 = vmax.f32 %v1871_v14, 0.0 }
 0x161   : > { %v1610_v20 = vadd.f32 %v3436_v3, %v1609_v9  ;;  %v2085_v22 = vmax.f32 %v1863_v13, 0.0  ;;  %v1866_v23 = vadd.f32 %v3436_v3, %v1865_v15  ;;  %v2021_v25 = vmax.f32 %v1607_v7, 0.0 }
 0x162   : > { %v2153_v21 = vadd.f32 %v2152_v12, %v2020_v11  ;;  %v3514_v24 = vadd.f32 %v2236_v18, %v2084_v17  ;;  %v1874_v30 = vadd.f32 %v2807_v8, %v3436_v3  ;;  %v2023_v34 = vmax.f32 %v1615_v19, 0.0 }
 0x163   : > { %v2022_v27 = vmax.f32 %v1610_v20, 0.0  ;;  %v2086_v31 = vmax.f32 %v1866_v23, 0.0  ;;  %v2024_v43 = vmax.f32 %v1618_v26, 0.0  ;;  %v2138_v5 = vadd.f32 %v2137_v53, %v2136_v33 }
 0x164   : > { %v2154_v28 = vrot.slane %v2153_v21, 4  ;;  %v2088_v49 = vmax.f32 %v1874_v30, 0.0 }
 0x165   : > { %v2746_v32 = vpop.f32.mrb[36].mxu0  ;;  %v2160_v35 = vadd.f32 %v2022_v27, %v2021_v25  ;;  %v2810_v36 = vpop.f32.mrb[36].mxu1  ;;  %v2244_v39 = vadd.f32 %v2086_v31, %v2085_v22 }
 0x166   : > { %v1622_v37 = vpop.f32.mrb[37].mxu0  ;;  %v2155_v38 = vadd.f32 %v2154_v28, %v2153_v21  ;;  %v1878_v41 = vpop.f32.mrb[37].mxu1  ;;  %v1887_v54 = vadd.f32 %v2810_v36, %v3436_v3  ;;  %v1631_v58 = vadd.f32 %v2746_v32, %v3436_v3 }
 0x167   : > { %v1623_v40 = vadd.f32 %v3436_v3, %v1622_v37  ;;  %v2747_v42 = vpop.f32.mrb[38].mxu0  ;;  %v2161_v44 = vadd.f32 %v2160_v35, %v2023_v34  ;;  %v1879_v45 = vadd.f32 %v3436_v3, %v1878_v41  ;;  %v2811_v46 = vpop.f32.mrb[38].mxu1  ;;  %v2245_v50 = vadd.f32 %v2244_v39, %v2087_v29 }
 0x168   : > { %v1625_v47 = vpop.f32.mrb[39].mxu0  ;;  %v2156_v48 = vrot.slane %v2155_v38, 2  ;;  %v1881_v52 = vpop.f32.mrb[39].mxu1  ;;  %v1634_v1 = vadd.f32 %v2747_v42, %v3436_v3  ;;  %v2091_v6 = vmax.f32 %v1887_v54, 0.0  ;;  %v1890_v7 = vadd.f32 %v2811_v46, %v3436_v3 }
 0x169   : > { %v2025_v51 = vmax.f32 %v1623_v40, 0.0  ;;  %v2162_v55 = vadd.f32 %v2161_v44, %v2024_v43  ;;  %v2089_v56 = vmax.f32 %v1879_v45, 0.0  ;;  %v2246_v59 = vadd.f32 %v2245_v50, %v2088_v49 }
 0x16a   : > { %v2157_v57 = vadd.f32 %v2156_v48, %v2155_v38  ;;  %v1626_v60 = vadd.f32 %v3436_v3, %v1625_v47  ;;  %v1882_v62 = vadd.f32 %v3436_v3, %v1881_v52  ;;  %v2027_v11 = vmax.f32 %v1631_v58, 0.0 }
 0x16b   : > { %v2163_v61 = vadd.f32 %v2162_v55, %v2025_v51  ;;  %v2247_v0 = vadd.f32 %v2246_v59, %v2089_v56  ;;  %v2028_v23 = vmax.f32 %v1634_v1, 0.0  ;;  %v2092_v28 = vmax.f32 %v1890_v7, 0.0 }
 0x16c   : > { %v2158_v63 = vrot.slane %v2157_v57, 1  ;;  %v2026_v2 = vmax.f32 %v1626_v60, 0.0  ;;  %v2090_v13 = vmax.f32 %v1882_v62, 0.0 }
 0x16d   : > { %v2750_v4 = vpop.f32.mrb[40].mxu0  ;;  %v2814_v8 = vpop.f32.mrb[40].mxu1 }
 0x16e   : > { %v1638_v9 = vpop.f32.mrb[41].mxu0  ;;  %v2159_v10 = vadd.f32 %v2158_v63, %v2157_v57  ;;  %v2164_v12 = vadd.f32 %v2163_v61, %v2026_v2  ;;  %v1894_v15 = vpop.f32.mrb[41].mxu1  ;;  %v2248_v18 = vadd.f32 %v2247_v0, %v2090_v13  ;;  %v1903_v30 = vadd.f32 %v2814_v8, %v3436_v3 }
 0x16f   : > { %v1639_v14 = vadd.f32 %v3436_v3, %v1638_v9  ;;  %v2751_v17 = vpop.f32.mrb[42].mxu0  ;;  %v1895_v19 = vadd.f32 %v3436_v3, %v1894_v15  ;;  %v2815_v20 = vpop.f32.mrb[42].mxu1  ;;  %v1647_v32 = vadd.f32 %v2750_v4, %v3436_v3 }
 0x170   : > { %v1641_v21 = vpop.f32.mrb[43].mxu0  ;;  %v3529_v22 = vsel %vm2294_vm2, %v2159_v10, %v2138_v5  ;;  %v2165_v25 = vadd.f32 %v2164_v12, %v2027_v11  ;;  %v1897_v27 = vpop.f32.mrb[43].mxu1  ;;  %v2249_v29 = vadd.f32 %v2248_v18, %v2091_v6  ;;  %v1650_v37 = vadd.f32 %v2751_v17, %v3436_v3 }
 0x171   : > { %v2029_v26 = vmax.f32 %v1639_v14, 0.0  ;;  %v2093_v31 = vmax.f32 %v1895_v19, 0.0  ;;  %v1642_v34 = vadd.f32 %v3436_v3, %v1641_v21  ;;  %v1898_v35 = vadd.f32 %v3436_v3, %v1897_v27 }
 0x172   : > { %v2166_v33 = vadd.f32 %v2165_v25, %v2028_v23  ;;  %v2250_v36 = vadd.f32 %v2249_v29, %v2092_v28  ;;  %v1906_v39 = vadd.f32 %v2815_v20, %v3436_v3  ;;  %v2095_v43 = vmax.f32 %v1903_v30, 0.0 }
 0x173   : > { %v2030_v40 = vmax.f32 %v1642_v34, 0.0  ;;  %v2094_v41 = vmax.f32 %v1898_v35, 0.0  ;;  %v2031_v47 = vmax.f32 %v1647_v32, 0.0  ;;  %v2032_v56 = vmax.f32 %v1650_v37, 0.0 }
 0x174   : > { %v2167_v38 = vadd.f32 %v2166_v33, %v2029_v26  ;;  %v2251_v44 = vadd.f32 %v2250_v36, %v2093_v31  ;;  %v2096_v57 = vmax.f32 %v1906_v39, 0.0 }
 0x175   : > { %v2754_v42 = vpop.f32.mrb[44].mxu0  ;;  %v2818_v45 = vpop.f32.mrb[44].mxu1 }
 0x176   : > { %v1654_v46 = vpop.f32.mrb[45].mxu0  ;;  %v2168_v48 = vadd.f32 %v2167_v38, %v2030_v40  ;;  %v1910_v50 = vpop.f32.mrb[45].mxu1  ;;  %v2252_v52 = vadd.f32 %v2251_v44, %v2094_v41  ;;  %v1919_v62 = vadd.f32 %v2818_v45, %v3436_v3  ;;  %v1663_v1 = vadd.f32 %v2754_v42, %v3436_v3 }
 0x177   : > { %v1655_v49 = vadd.f32 %v3436_v3, %v1654_v46  ;;  %v2755_v51 = vpop.f32.mrb[46].mxu0  ;;  %v1911_v53 = vadd.f32 %v3436_v3, %v1910_v50  ;;  %v2819_v54 = vpop.f32.mrb[46].mxu1 }
 0x178   : > { %v1657_v55 = vpop.f32.mrb[47].mxu0  ;;  %v2169_v58 = vadd.f32 %v2168_v48, %v2031_v47  ;;  %v1913_v60 = vpop.f32.mrb[47].mxu1  ;;  %v2253_v61 = vadd.f32 %v2252_v52, %v2095_v43  ;;  %v1666_v13 = vadd.f32 %v2755_v51, %v3436_v3  ;;  %v2099_v10 = vmax.f32 %v1919_v62, 0.0 }
 0x179   : > { %v2033_v59 = vmax.f32 %v1655_v49, 0.0  ;;  %v2097_v63 = vmax.f32 %v1911_v53, 0.0  ;;  %v1658_v0 = vadd.f32 %v3436_v3, %v1657_v55  ;;  %v1914_v4 = vadd.f32 %v3436_v3, %v1913_v60 }
 0x17a   : > { %v2170_v2 = vadd.f32 %v2169_v58, %v2032_v56  ;;  %v2254_v5 = vadd.f32 %v2253_v61, %v2096_v57  ;;  %v1922_v12 = vadd.f32 %v2819_v54, %v3436_v3  ;;  %v2035_v17 = vmax.f32 %v1663_v1, 0.0 }
 0x17b   : > { %v2034_v6 = vmax.f32 %v1658_v0, 0.0  ;;  %v2098_v8 = vmax.f32 %v1914_v4, 0.0  ;;  %v2036_v28 = vmax.f32 %v1666_v13, 0.0 }
 0x17c   : > { %v2171_v7 = vadd.f32 %v2170_v2, %v2033_v59  ;;  %v2255_v11 = vadd.f32 %v2254_v5, %v2097_v63  ;;  %v2100_v32 = vmax.f32 %v1922_v12, 0.0 }
 0x17d   : > { %v2758_v9 = vpop.f32.mrb[48].mxu0  ;;  %v2822_v14 = vpop.f32.mrb[48].mxu1 }
 0x17e   : > { %v1670_v15 = vpop.f32.mrb[49].mxu0  ;;  %v2172_v18 = vadd.f32 %v2171_v7, %v2034_v6  ;;  %v1926_v19 = vpop.f32.mrb[49].mxu1  ;;  %v2256_v21 = vadd.f32 %v2255_v11, %v2098_v8  ;;  %v1935_v30 = vadd.f32 %v2822_v14, %v3436_v3  ;;  %v1679_v34 = vadd.f32 %v2758_v9, %v3436_v3 }
 0x17f   : > { %v2759_v20 = vpop.f32.mrb[50].mxu0  ;;  %v1671_v23 = vadd.f32 %v3436_v3, %v1670_v15  ;;  %v1927_v25 = vadd.f32 %v3436_v3, %v1926_v19  ;;  %v2823_v26 = vpop.f32.mrb[50].mxu1 }
 0x180   : > { %v1673_v27 = vpop.f32.mrb[51].mxu0  ;;  %v2173_v29 = vadd.f32 %v2172_v18, %v2035_v17  ;;  %v1929_v31 = vpop.f32.mrb[51].mxu1  ;;  %v2257_v33 = vadd.f32 %v2256_v21, %v2099_v10  ;;  %v1682_v41 = vadd.f32 %v2759_v20, %v3436_v3  ;;  %v2103_v44 = vmax.f32 %v1935_v30, 0.0 }
 0x181   : > { %v1674_v35 = vadd.f32 %v3436_v3, %v1673_v27  ;;  %v2101_v37 = vmax.f32 %v1927_v25, 0.0  ;;  %v1930_v38 = vadd.f32 %v3436_v3, %v1929_v31  ;;  %v2037_v40 = vmax.f32 %v1671_v23, 0.0 }
 0x182   : > { %v2174_v36 = vadd.f32 %v2173_v29, %v2036_v28  ;;  %v3551_v39 = vadd.f32 %v2257_v33, %v2100_v32  ;;  %v1938_v45 = vadd.f32 %v2823_v26, %v3436_v3  ;;  %v2039_v48 = vmax.f32 %v1679_v34, 0.0 }
 0x183   : > { %v2038_v42 = vmax.f32 %v1674_v35, 0.0  ;;  %v2102_v46 = vmax.f32 %v1930_v38, 0.0  ;;  %v2040_v57 = vmax.f32 %v1682_v41, 0.0 }
 0x184   : > { %v2175_v43 = vrot.slane %v2174_v36, 4  ;;  %v2104_v63 = vmax.f32 %v1938_v45, 0.0 }
 0x185   : > { %v2762_v47 = vpop.f32.mrb[52].mxu0  ;;  %v2181_v49 = vadd.f32 %v2038_v42, %v2037_v40  ;;  %v2826_v50 = vpop.f32.mrb[52].mxu1  ;;  %v2265_v53 = vadd.f32 %v2102_v46, %v2101_v37 }
 0x186   : > { %v1686_v51 = vpop.f32.mrb[53].mxu0  ;;  %v2176_v52 = vadd.f32 %v2175_v43, %v2174_v36  ;;  %v1942_v55 = vpop.f32.mrb[53].mxu1  ;;  %v1951_v4 = vadd.f32 %v2826_v50, %v3436_v3  ;;  %v1695_v13 = vadd.f32 %v2762_v47, %v3436_v3 }
 0x187   : > { %v1687_v54 = vadd.f32 %v3436_v3, %v1686_v51  ;;  %v2763_v56 = vpop.f32.mrb[54].mxu0  ;;  %v2182_v58 = vadd.f32 %v2181_v49, %v2039_v48  ;;  %v1943_v59 = vadd.f32 %v3436_v3, %v1942_v55  ;;  %v2827_v60 = vpop.f32.mrb[54].mxu1  ;;  %v2266_v0 = vadd.f32 %v2265_v53, %v2103_v44 }
 0x188   : > { %v1689_v61 = vpop.f32.mrb[55].mxu0  ;;  %v2177_v62 = vrot.slane %v2176_v52, 2  ;;  %v1945_v2 = vpop.f32.mrb[55].mxu1  ;;  %v1698_v15 = vadd.f32 %v2763_v56, %v3436_v3  ;;  %v2107_v19 = vmax.f32 %v1951_v4, 0.0  ;;  %v1954_v20 = vadd.f32 %v2827_v60, %v3436_v3 }
 0x189   : > { %v2041_v1 = vmax.f32 %v1687_v54, 0.0  ;;  %v2183_v5 = vadd.f32 %v2182_v58, %v2040_v57  ;;  %v2105_v6 = vmax.f32 %v1943_v59, 0.0  ;;  %v2267_v8 = vadd.f32 %v2266_v0, %v2104_v63 }
 0x18a   : > { %v2178_v7 = vadd.f32 %v2177_v62, %v2176_v52  ;;  %v1690_v9 = vadd.f32 %v3436_v3, %v1689_v61  ;;  %v1946_v11 = vadd.f32 %v3436_v3, %v1945_v2  ;;  %v2043_v27 = vmax.f32 %v1695_v13, 0.0 }
 0x18b   : > { %v2184_v10 = vadd.f32 %v2183_v5, %v2041_v1  ;;  %v2268_v14 = vadd.f32 %v2267_v8, %v2105_v6  ;;  %v2044_v37 = vmax.f32 %v1698_v15, 0.0  ;;  %v2108_v42 = vmax.f32 %v1954_v20, 0.0 }
 0x18c   : > { %v2179_v12 = vrot.slane %v2178_v7, 1  ;;  %v2042_v17 = vmax.f32 %v1690_v9, 0.0  ;;  %v2106_v21 = vmax.f32 %v1946_v11, 0.0 }
 0x18d   : > { %v2766_v18 = vpop.f32.mrb[56].mxu0  ;;  %v2830_v23 = vpop.f32.mrb[56].mxu1 }
 0x18e   : > { %v1702_v25 = vpop.f32.mrb[57].mxu0  ;;  %v2180_v26 = vadd.f32 %v2179_v12, %v2178_v7  ;;  %v2185_v28 = vadd.f32 %v2184_v10, %v2042_v17  ;;  %v1958_v30 = vpop.f32.mrb[57].mxu1  ;;  %v2269_v32 = vadd.f32 %v2268_v14, %v2106_v21  ;;  %v1967_v44 = vadd.f32 %v2830_v23, %v3436_v3 }
 0x18f   : > { %v1703_v29 = vadd.f32 %v3436_v3, %v1702_v25  ;;  %v2767_v31 = vpop.f32.mrb[58].mxu0  ;;  %v1959_v33 = vadd.f32 %v3436_v3, %v1958_v30  ;;  %v2831_v34 = vpop.f32.mrb[58].mxu1  ;;  %v1711_v46 = vadd.f32 %v2766_v18, %v3436_v3  ;;  %v2238_v23 = vrot.slane %v3514_v24, 4 }
 0x190   : > { %v1705_v35 = vpop.f32.mrb[59].mxu0  ;;  %v3567_v36 = vsel %vm2296_vm3, %v2180_v26, %v3529_v22  ;;  %v2186_v38 = vadd.f32 %v2185_v28, %v2043_v27  ;;  %v1961_v41 = vpop.f32.mrb[59].mxu1  ;;  %v2270_v43 = vadd.f32 %v2269_v32, %v2107_v19  ;;  %v1714_v22 = vadd.f32 %v2767_v31, %v3436_v3  ;;  %v3014_v26 = vld [vmem:[%s3688_s2] ss:$0 sm:$0xff] }
 0x191   : > { %v2045_v40 = vmax.f32 %v1703_v29, 0.0  ;;  %v2109_v45 = vmax.f32 %v1959_v33, 0.0  ;;  %v1706_v48 = vadd.f32 %v3436_v3, %v1705_v35  ;;  %v1962_v49 = vadd.f32 %v3436_v3, %v1961_v41 }
 0x192   : > { %v2187_v47 = vadd.f32 %v2186_v38, %v2044_v37  ;;  %v2271_v50 = vadd.f32 %v2270_v43, %v2108_v42  ;;  %v1970_v52 = vadd.f32 %v2831_v34, %v3436_v3  ;;  %v2111_v56 = vmax.f32 %v1967_v44, 0.0 }
 0x193   : > { %v2046_v53 = vmax.f32 %v1706_v48, 0.0  ;;  %v2110_v54 = vmax.f32 %v1962_v49, 0.0  ;;  %v2047_v60 = vmax.f32 %v1711_v46, 0.0  ;;  %v2048_v6 = vmax.f32 %v1714_v22, 0.0 }
 0x194   : > { %v2188_v51 = vadd.f32 %v2187_v47, %v2045_v40  ;;  %v2272_v57 = vadd.f32 %v2271_v50, %v2109_v45  ;;  %v2112_v7 = vmax.f32 %v1970_v52, 0.0  ;;  %v2217_v19 = vrot.slane %v3477_v16, 4 }
 0x195   : > { %v2770_v55 = vpop.f32.mrb[60].mxu0  ;;  %v2834_v58 = vpop.f32.mrb[60].mxu1  ;;  %v2259_v29 = vrot.slane %v3551_v39, 4  ;;  %v2239_v37 = vadd.f32 %v2238_v23, %v3514_v24  ;;  %v2324_v23 = vld [vmem:[%s3689_s3 + $0x38] sm:$0xff] (!%p2617_p10) }
 0x196   : > { %v1718_v59 = vpop.f32.mrb[61].mxu0  ;;  %v2189_v61 = vadd.f32 %v2188_v51, %v2046_v53  ;;  %v1974_v63 = vpop.f32.mrb[61].mxu1  ;;  %v2273_v1 = vadd.f32 %v2272_v57, %v2110_v54  ;;  %v1983_v11 = vadd.f32 %v2834_v58, %v3436_v3  ;;  %v1727_v15 = vadd.f32 %v2770_v55, %v3436_v3 }
 0x197   : > { %v1719_v62 = vadd.f32 %v3436_v3, %v1718_v59  ;;  %v2771_v0 = vpop.f32.mrb[62].mxu0  ;;  %v1975_v2 = vadd.f32 %v3436_v3, %v1974_v63  ;;  %v2835_v4 = vpop.f32.mrb[62].mxu1  ;;  %v2218_v34 = vadd.f32 %v2217_v19, %v3477_v16  ;;  %v2260_v41 = vadd.f32 %v2259_v29, %v3551_v39  ;;  %v2322_v19 = vld [vmem:[%s3689_s3 + $0x28] sm:$0xff] (!%p2617_p10)  ;;  %v2327_v29 = vld [vmem:[%s3689_s3 + $0x50] sm:$0xff] (!%p2617_p10) }
 0x198   : > { %v1721_v5 = vpop.f32.mrb[63].mxu0  ;;  %v2190_v13 = vadd.f32 %v2189_v61, %v2047_v60  ;;  %v1977_v9 = vpop.f32.mrb[63].mxu1  ;;  %v2274_v10 = vadd.f32 %v2273_v1, %v2111_v56  ;;  %v1730_v27 = vadd.f32 %v3014_v26, %v2771_v0  ;;  %v2115_v30 = vmax.f32 %v1983_v11, 0.0 }
 0x199   : > { %v2049_v8 = vmax.f32 %v1719_v62, 0.0  ;;  %v2113_v12 = vmax.f32 %v1975_v2, 0.0  ;;  %v1722_v14 = vadd.f32 %v3436_v3, %v1721_v5  ;;  %v1978_v18 = vadd.f32 %v3436_v3, %v1977_v9  ;;  %v2317_v9 = vld [vmem:[%s3689_s3] sm:$0xff] (!%p2617_p10) }
 0x19a   : > { %v2191_v17 = vadd.f32 %v2190_v13, %v2048_v6  ;;  %v2275_v20 = vadd.f32 %v2274_v10, %v2112_v7  ;;  %v1986_v32 = vadd.f32 %v3014_v26, %v2835_v4  ;;  %v2051_v33 = vmax.f32 %v1727_v15, 0.0  ;;  %v2117_v4 = vld [vmem:[#allocation2] sm:$0xff]  ;;  %v2319_v10 = vld [vmem:[%s3689_s3 + $0x10] sm:$0xff] (!%p2617_p10) }
 0x19b   : > { %v2050_v21 = vmax.f32 %v1722_v14, 0.0  ;;  %v2114_v28 = vmax.f32 %v1978_v18, 0.0  ;;  %v2052_v38 = vmax.f32 %v1730_v27, 0.0  ;;  %v2219_v45 = vrot.slane %v2218_v34, 2  ;;  %v2320_v14 = vld [vmem:[%s3689_s3 + $0x18] sm:$0xff] (!%p2617_p10)  ;;  %v2321_v18 = vld [vmem:[%s3689_s3 + $0x20] sm:$0xff] (!%p2617_p10) }
 0x19c   : > { %v2192_v25 = vadd.f32 %v2191_v17, %v2049_v8  ;;  %v2276_v31 = vadd.f32 %v2275_v20, %v2113_v12  ;;  %v2116_v42 = vmax.f32 %v1986_v32, 0.0  ;;  %v2240_v47 = vrot.slane %v2239_v37, 2  ;;  %v2325_v26 = vld [vmem:[%s3689_s3 + $0x40] sm:$0xff] (!%p2617_p10)  ;;  %v2326_v27 = vld [vmem:[%s3689_s3 + $0x48] sm:$0xff] (!%p2617_p10) }
 0x19d   : > { %v2261_v49 = vrot.slane %v2260_v41, 2  ;;  %v2220_v51 = vadd.f32 %v2219_v45, %v2218_v34  ;;  %v3086_v11 = vmov (!%p2617_p10), 0.0|0.0   ;;  %v3088_v15 = vmov (!%p2617_p10), 0.0   ;;  %v2329_v32 = vld [vmem:[%s3689_s3 + $0x60] sm:$0xff] (!%p2617_p10)  ;;  %v2331_v34 = vld [vmem:[%s3689_s3 + $0x70] sm:$0xff] (!%p2617_p10) }
 0x19e   : > { %v2193_v3 = vadd.f32 %v2192_v25, %v2050_v21  ;;  %v2277_v35 = vadd.f32 %v2276_v31, %v2114_v28  ;;  %v2241_v16 = vadd.f32 %v2240_v47, %v2239_v37  ;;  %2871 = vmatprep.subr.bf16.mxu0 (!%p2617_p10), %v3086_v11  ;;  %2868 = vmatprep.mubr.msk.f32.mxu0 (!%p2617_p10), %vm3087_vm9, %v3088_v15  ;;  %v2323_v21 = vld [vmem:[%s3689_s3 + $0x30] sm:$0xff] (!%p2617_p10) }
 0x19f   : > { %v2262_v54 = vadd.f32 %v2261_v49, %v2260_v41  ;;  %v2221_v56 = vrot.slane %v2220_v51, 1  ;;  %v2875_v17 = vpack.c.bf16 (!%p2617_p10), %v2320_v14, %v2319_v10  ;;  %v2878_v20 = vpack.c.bf16 (!%p2617_p10), %v2322_v19, %v2321_v18  ;;  %v2618_v41 = vld [vmem:[%s3690_s4] ss:$0 sm:$0xff] (!%p2617_p10) }
 0x1a0   : > { %v2194_v40 = vadd.f32 %v2193_v3, %v2051_v33  ;;  %v2278_v43 = vadd.f32 %v2277_v35, %v2115_v30  ;;  %v2242_v39 = vrot.slane %v2241_v16, 1  ;;  %v2881_v25 = vpack.c.bf16 (!%p2617_p10), %v2324_v23, %v2323_v21  ;;  %v2328_v30 = vld [vmem:[%s3689_s3 + $0x58] sm:$0xff] (!%p2617_p10)  ;;  %v2330_v33 = vld [vmem:[%s3689_s3 + $0x68] sm:$0xff] (!%p2617_p10) }
 0x1a1   : > { %v2263_v59 = vrot.slane %v2262_v54, 1  ;;  %v2222_v62 = vadd.f32 %v2221_v56, %v2220_v51  ;;  %v2884_v28 = vpack.c.bf16 (!%p2617_p10), %v2326_v27, %v2325_v26  ;;  %v2887_v31 = vpack.c.bf16 (!%p2617_p10), %v2328_v30, %v2327_v29  ;;  %v2332_v35 = vld [vmem:[%s3689_s3 + $0x78] sm:$0xff] (!%p2617_p10) }
 0x1a2   : > { %v2195_v44 = vadd.f32 %v2194_v40, %v2052_v38  ;;  %v2279_v46 = vadd.f32 %v2278_v43, %v2116_v42  ;;  %v2243_v63 = vadd.f32 %v2242_v39, %v2241_v16  ;;  %v2890_v3 = vpack.c.bf16 (!%p2617_p10), %v2330_v33, %v2329_v32 }
 0x1a3   : > { %v2264_v1 = vadd.f32 %v2263_v59, %v2262_v54  ;;  %v2893_v37 = vpack.c.bf16 (!%p2617_p10), %v2332_v35, %v2331_v34 }
 0x1a4   : > { %v2196_v48 = vrot.slane %v2195_v44, 4  ;;  %v2280_v50 = vrot.slane %v2279_v46, 4 }
 0x1a6   : > { %v2197_v22 = vadd.f32 %v2196_v48, %v2195_v44  ;;  %v2281_v52 = vadd.f32 %v2280_v50, %v2279_v46 }
 0x1a8   : > { %v2198_v53 = vrot.slane %v2197_v22, 2  ;;  %v2282_v24 = vrot.slane %v2281_v52, 2 }
 0x1aa   : > { %v2199_v55 = vadd.f32 %v2198_v53, %v2197_v22  ;;  %v2283_v57 = vadd.f32 %v2282_v24, %v2281_v52 }
 0x1ac   : > { %v2200_v58 = vrot.slane %v2199_v55, 1  ;;  %v2284_v61 = vrot.slane %v2283_v57, 1 }
 0x1ae   : > { %v2201_v60 = vadd.f32 %v2200_v58, %v2199_v55  ;;  %v2285_v5 = vadd.f32 %v2284_v61, %v2283_v57 }
 0x1b0   : > { %v2299_v0 = vsel %vm2298_vm4, %v2201_v60, %v3567_v36  ;;  %v2318_v36 = vld [vmem:[%s3689_s3 + $0x8] sm:$0xff] (!%p2617_p10) }
 0x1b1   : > { %v2301_v2 = vsel %vm2300_vm5, %v2222_v62, %v2299_v0  ;;  %2314 = sbr.rel (%p2617_p10) target bundleno = 681 (0x2a9), region = 89  ;;  %v2872_v12 = vpack.c.bf16 (!%p2617_p10), %v2318_v36, %v2317_v9 }
 0x1b2   : > { %v2303_v6 = vsel %vm2302_vm6, %v2243_v63, %v2301_v2 }
 0x1b3   : > { %v2305_v7 = vsel %vm2304_vm7, %v2264_v1, %v2303_v6  ;;  %2873 = vmatpush3.bf16.msra.mxu0 (!%p2617_p10), %v2872_v12 }
 0x1b4   : > { %v2307_v13 = vsel %vm2306_vm8, %v2285_v5, %v2305_v7  ;;  %2874 = vmatprep.subr.bf16.mxu0 (!%p2617_p10), %v3086_v11 }
 0x1b5   : > { %v2309_v8 = vadd.f32 %v2307_v13, %v2117_v4 }
 0x1b7   : > { %2310 = vst [vmem:[#allocation2] sm:$0xff] %v2309_v8  ;;  %2876 = vmatpush3.bf16.msra.mxu0 (!%p2617_p10), %v2875_v17 }
 0x1b8   : > { %2877 = vmatprep.subr.bf16.mxu0 %v3086_v11 }
 0x1bb   : > { %2879 = vmatpush3.bf16.msra.mxu0 %v2878_v20 }
 0x1bc   : > { %2880 = vmatprep.subr.bf16.mxu0 %v3086_v11 }
 0x1be   : > { %v2315_v38 = vld [vmem:[#allocation2] sm:$0xff] }
 0x1bf   : > { %2882 = vmatpush3.bf16.msra.mxu0 %v2881_v25  ;;  %v2316_v40 = vmul.f32 0.00390625, %v2315_v38 }
 0x1c0   : > { %2883 = vmatprep.subr.bf16.mxu0 %v3086_v11 }
 0x1c3   : > { %2885 = vmatpush3.bf16.msra.mxu0 %v2884_v28 }
 0x1c4   : > { %2886 = vmatprep.subr.bf16.mxu0 %v3086_v11 }
 0x1c7   : > { %2888 = vmatpush3.bf16.msra.mxu0 %v2887_v31 }
 0x1c8   : > { %2889 = vmatprep.subr.bf16.mxu0 %v3086_v11 }
 0x1cb   : > { %2891 = vmatpush3.bf16.msra.mxu0 %v2890_v3 }
 0x1cc   : > { %2892 = vmatprep.subr.bf16.mxu0 %v3086_v11 }
 0x1cf   : > { %2894 = vmatpush3.bf16.msra.mxu0 %v2893_v37 }
 0x1d2   : > { %2869 = vmatmul.mubr.f32.vlgmr.msra.gmra.mrb[0].mxu0 %v2316_v40 }
 0x2a5   : > { %v2406_v42 = vpop.f32.mrb[0].mxu0 }
 0x2a6   : > { %v2407_v43 = vadd.f32 %v2618_v41, %v2406_v42  ;;  %v2870_v44 = vpop.f32.mrb[1].mxu0 }
 0x2a8   : > { %2410 = vst [vmem:[#allocation4] sm:$0xff] %v2407_v43 }
 0x2a9 PF: > { %p3645_p11 = scmp.eq.s32.totalorder %s2479_s23, 1  ;;  %s3089_s16 = smov [#allocation4]  }
 0x2aa   : > { %s2420_s17 = sshll.u32 %s3089_s16, 4  ;;  %s2421_s17 = int_to_ptr.vmem [resolvable:$true] %s2420_s17 }
 0x2ab   : > { %s3015_s18 = scalar_lea.vmem %s2421_s17, 128  ;;  %p3022_p1 = scmp.lt.s32.totalorder %s2421_s17, %s2421_s17 }
 0x2ac   : > { %p3016_p12 = scmp.ne.s32.totalorder %s2421_s17, %s3015_s18  ;;  %p3023_p2 = scmp.lt.s32.totalorder %s3015_s18, %s3015_s18 }
 0x2ae   : > { %p3017_p13 = pnand %p3016_p12, %p3645_p11  ;;  %p3024_p3 = por %p3023_p2, %p3022_p1 }
 0x2b0   : > { %p3018_p0 = pneg %p3017_p13 }
 0x2b2   : > { %p3025_p4 = pnand %p3024_p3, %p3018_p0 }
 0x2b4   : > { %3028 = shalt.err (!%p3025_p4)
}
 0x2b5   : > { %s3029_s23 = scalar_lea.hbm %s3691_s5, 128 }
 0x2b6   : > { %p3030_p5 = scmp.ne.s32.totalorder %s3691_s5, %s3029_s23  ;;  %p3035_p8 = scmp.lt.u32.totalorder %s3029_s23, %s3691_s5 }
 0x2b8   : > { %p3031_p6 = pnand %p3030_p5, %p3645_p11 }
 0x2ba   : > { %p3032_p7 = pneg %p3031_p6 }
 0x2bc   : > { %p3037_p9 = pnand %p3035_p8, %p3032_p7 }
 0x2be   : > { %3040 = shalt.err (!%p3037_p9)
}
 0x2bf   : > { %2900 = dma.vmem_to_hbm [thread:$0]  (%p3645_p11), %s2421_s17, 128, %s3691_s5, [#allocation5]  }
 0x2c0   : > { %3062 = dma.done.wait (%p3645_p11), [#allocation5], 128  }
 0x2c1   : > { %3064 = vsyncadd (%p3645_p11), [#allocation5], 4294967168 }
 0x2c2 PF: > { %s16_s22 = sadd.s32 1, %s3083_s22   ;;  %s3693_s18 = smov %s3071_s19 }
 0x2c3   : > { %p13_p10 = scmp.ge.s32.totalorder %s16_s22, 4   ;;  %s3694_s19 = smov %s3156_s27 }
 0x2c4   : > { %s3695_s20 = smov %s3079_s21  ;;  %s3696_s21 = smov %s3698_s24 }
 0x2c5   :  { %15 = sbr.rel (!%p13_p10) target bundleno = 3 (0x3), region = 122 }
 0x2cc   :  { %2433 = vsyncpa [#allocation5], 1 }
 0x2cd   :  { %2435 = vsyncpa [#allocation5 + $0x1], 1 }

</bundles_post_ra>
